<compile_context>
chip_gen: v5e
topology: v5e:2x2
jax: 0.10.0
libtpu: 0.0.40
codegen_flags: <defaults>
</compile_context>

<pallas_src>
import math
import functools

import jax
import jax.numpy as jnp
from jax import lax
from jax.experimental import pallas as pl
from jax.experimental.pallas import tpu as pltpu


def _layernorm(v, gamma, beta, eps):
    mu = jnp.mean(v, axis=-1, keepdims=True)
    var = jnp.mean((v - mu) ** 2, axis=-1, keepdims=True)
    return (v - mu) / jnp.sqrt(var + eps) * gamma + beta


def vit_block_kernel(x_ref,
                     g1_ref, b1_ref,
                     wqkv_ref, bqkv_ref,
                     wp_ref, bp_ref,
                     g2_ref, b2_ref,
                     w1_ref, bf1_ref,
                     w2_ref, bf2_ref,
                     o_ref,
                     *, num_heads, head_dim, eps, t_valid, approx_recip):
    f32 = jnp.float32
    cdt = wqkv_ref.dtype                    # MXU operand dtype (bf16 or f32)
    x = x_ref[0].astype(f32)                # (T, E)
    T, E = x.shape
    H, hd = num_heads, head_dim

    # ---- LayerNorm 1 (f32) ----
    h = _layernorm(x, g1_ref[...], b1_ref[...], eps)        # (T, E)
    h_c = h.astype(cdt)

    # ---- QKV: one lane-dense (T,E) @ (E,3E) matmul.  sqrt(head_dim) is
    #      pre-folded into the q columns of wqkv / bqkv by the wrapper. ----
    qkv = jnp.dot(h_c, wqkv_ref[...], preferred_element_type=f32) + bqkv_ref[...]

    def to_heads(m):                                        # (T,E) -> (H,T,hd)
        return jnp.transpose(m.reshape(T, H, hd), (1, 0, 2))

    q = to_heads(qkv[:, :E]).astype(cdt)
    k = to_heads(qkv[:, E:2 * E]).astype(cdt)
    v = to_heads(qkv[:, 2 * E:]).astype(cdt)

    # ---- Scores: head-batched, contract head_dim of both operands ----
    s = jnp.einsum('hqd,hkd->hqk', q, k,
                   preferred_element_type=f32)              # (H, T, T), f32

    if t_valid != T:   # key-side mask for padded tokens (static branch)
        # -1e30 is safe because s stays in f32 (dtype-aware if this changes).
        key_mask = lax.broadcasted_iota(jnp.int32, (1, 1, T), 2) < t_valid
        s = jnp.where(key_mask, s, jnp.float32(-1e30))

    # ---- Softmax in f32; normalization applied after the PV matmul ----
    m = jnp.max(s, axis=-1, keepdims=True)
    p = jnp.exp(s - m)
    l = jnp.sum(p, axis=-1, keepdims=True)

    o_h = jnp.einsum('hqk,hkd->hqd', p.astype(cdt), v,
                     preferred_element_type=f32)            # (H, T, hd)
    o_h = o_h * pl.reciprocal(l, approx=approx_recip)

    # ---- Merge heads once, then one K=E output projection ----
    mha = jnp.transpose(o_h, (1, 0, 2)).reshape(T, E)       # (T, E)
    attn = jnp.dot(mha.astype(cdt), wp_ref[...],
                   preferred_element_type=f32) + bp_ref[...]

    x2 = attn + h            # residual on the *normed* x (as in the spec)

    # ---- LayerNorm 2 (f32) ----
    h2 = _layernorm(x2, g2_ref[...], b2_ref[...], eps)

    # ---- MLP: fc1 -> exact GELU -> fc2 ----
    z = jnp.dot(h2.astype(cdt), w1_ref[...],
                preferred_element_type=f32) + bf1_ref[...]              # (T, mlp)
    z = 0.5 * z * (1.0 + lax.erf(z * jnp.float32(1.0 / math.sqrt(2.0))))
    y = jnp.dot(z.astype(cdt), w2_ref[...],
                preferred_element_type=f32) + bf2_ref[...]              # (T, E)

    o_ref[0] = (y + h2).astype(o_ref.dtype)


def vit_block(x, params, *, num_heads, eps=1e-6, matmul_dtype=jnp.bfloat16):
    B, T, E = x.shape
    H = num_heads
    hd = E // H
    assert hd * H == E, "embed_dim must be divisible by num_heads"
    mlp_dim = params["w1"].shape[1]

    # Pad tokens: multiple of 16 (bf16 sublane packing); lane-dense 128 when
    # the sequence is long enough for it to matter (e.g. 197 -> 256).
    pad_to = 128 if T >= 128 else 16
    Tp = ((T + pad_to - 1) // pad_to) * pad_to
    x_in = x if Tp == T else jnp.pad(x, ((0, 0), (0, Tp - T), (0, 0)))

    f32 = jnp.float32
    scale = jnp.float32(math.sqrt(hd))

    # Merged QKV weight with sqrt(head_dim) folded into the q columns/bias
    # (done once at trace time, not per batch element inside the kernel).
    wqkv = params["wqkv"].astype(f32).at[:, :E].multiply(scale).astype(matmul_dtype)
    bqkv = params["bqkv"].astype(f32).at[:E].multiply(scale).reshape(1, 3 * E)

    plist = [
        params["g1"].reshape(1, E).astype(f32), params["b1"].reshape(1, E).astype(f32),
        wqkv, bqkv,
        params["wproj"].astype(matmul_dtype), params["bproj"].reshape(1, E).astype(f32),
        params["g2"].reshape(1, E).astype(f32), params["b2"].reshape(1, E).astype(f32),
        params["w1"].astype(matmul_dtype), params["bf1"].reshape(1, mlp_dim).astype(f32),
        params["w2"].astype(matmul_dtype), params["bf2"].reshape(1, E).astype(f32),
    ]

    kernel = functools.partial(
        vit_block_kernel, num_heads=H, head_dim=hd, eps=eps, t_valid=T,
        approx_recip=(matmul_dtype == jnp.bfloat16))

    # VMEM budget: weights + activation temporaries + double-buffered in/out
    # blocks, with headroom; capped at 48 MiB so we never claim all of the
    # 64 MiB per-TensorCore VMEM on v7x (128 MiB on v5e/v6e is not binding).
    cd_bytes = jnp.dtype(matmul_dtype).itemsize
    w_bytes = sum(int(p.size) * p.dtype.itemsize for p in plist)
    act_bytes = (Tp * 3 * E * (4 + cd_bytes)      # qkv f32 + q/k/v cdt copies
                 + 2 * H * Tp * Tp * 4            # scores + probs (f32)
                 + H * Tp * hd * 4                # attention output (f32)
                 + 2 * Tp * mlp_dim * 4           # MLP intermediate (+GELU)
                 + 8 * Tp * E * 4)                # LN / residual temporaries
    io_bytes = 2 * 2 * Tp * E * x.dtype.itemsize  # double-buffered x/out blocks
    vmem_limit = int(min(max(1.5 * (w_bytes + act_bytes + io_bytes),
                             24 * 1024 * 1024), 48 * 1024 * 1024))

    # Weights: untiled VMEM residents (constant across the batch grid, so they
    # should be single-buffered; verify in the VMEM usage report on v7x).
    weight_spec = pl.BlockSpec(memory_space=pltpu.MemorySpace.VMEM)

    out = pl.pallas_call(
        kernel,
        out_shape=jax.ShapeDtypeStruct((B, Tp, E), x.dtype),
        grid=(B,),
        in_specs=[pl.BlockSpec((1, Tp, E), lambda b: (b, 0, 0))]
                 + [weight_spec] * len(plist),
        out_specs=pl.BlockSpec((1, Tp, E), lambda b: (b, 0, 0)),
        compiler_params=pltpu.CompilerParams(
            dimension_semantics=("parallel",),        # megacore on v7x
            vmem_limit_bytes=vmem_limit),
    )(x_in, *plist)

    return out if Tp == T else out[:, :T, :]


def vit_block_reference(x, params, *, num_heads, eps=1e-6):
    """Pure-JAX mirror of the PyTorch forward for verification."""
    B, T, E = x.shape
    hd = E // num_heads

    def ln(v, g, b):
        mu = v.mean(-1, keepdims=True)
        var = ((v - mu) ** 2).mean(-1, keepdims=True)
        return (v - mu) / jnp.sqrt(var + eps) * g + b

    h = ln(x, params["g1"], params["b1"])
    qkv = h @ params["wqkv"] + params["bqkv"]                    # (B,T,3E)
    qkv = qkv.reshape(B, T, 3, num_heads, hd).transpose(2, 0, 3, 1, 4)
    q, k, v = qkv[0], qkv[1], qkv[2]                             # (B,H,T,hd)
    s = jnp.einsum("bhqd,bhkd->bhqk", q, k) * math.sqrt(hd)
    s = jax.nn.softmax(s, axis=-1)
    mha = jnp.einsum("bhqk,bhkd->bhqd", s, v).transpose(0, 2, 1, 3).reshape(B, T, E)
    attn = mha @ params["wproj"] + params["bproj"]
    x2 = attn + h
    h2 = ln(x2, params["g2"], params["b2"])
    z = h2 @ params["w1"] + params["bf1"]
    z = 0.5 * z * (1.0 + lax.erf(z / math.sqrt(2.0)))
    z = z @ params["w2"] + params["bf2"]
    return z + h2


def init_params(key, embed_dim, mlp_dim):
    ks = jax.random.split(key, 8)
    s = 0.02
    # Linear weights stored pre-transposed as (in_features, out_features).
    return {
        "g1": jnp.ones((embed_dim,), jnp.float32),
        "b1": jnp.zeros((embed_dim,), jnp.float32),
        "wqkv": s * jax.random.normal(ks[0], (embed_dim, 3 * embed_dim), jnp.float32),
        "bqkv": s * jax.random.normal(ks[1], (3 * embed_dim,), jnp.float32),
        "wproj": s * jax.random.normal(ks[2], (embed_dim, embed_dim), jnp.float32),
        "bproj": s * jax.random.normal(ks[3], (embed_dim,), jnp.float32),
        "g2": jnp.ones((embed_dim,), jnp.float32),
        "b2": jnp.zeros((embed_dim,), jnp.float32),
        "w1": s * jax.random.normal(ks[4], (embed_dim, mlp_dim), jnp.float32),
        "bf1": s * jax.random.normal(ks[5], (mlp_dim,), jnp.float32),
        "w2": s * jax.random.normal(ks[6], (mlp_dim, embed_dim), jnp.float32),
        "bf2": s * jax.random.normal(ks[7], (embed_dim,), jnp.float32),
    }


if __name__ == "__main__":
    # Small but TPU-friendly shapes (even batch, T=10 exercises padding+mask).
    B, T, E, H, MLP_DIM = 2, 10, 64, 4, 128

    key = jax.random.PRNGKey(0)
    kx, kp = jax.random.split(key)
    x = jax.random.normal(kx, (B, T, E), jnp.float32)
    params = init_params(kp, E, MLP_DIM)

    ref = vit_block_reference(x, params, num_heads=H)

    # f32 MXU path (exact softmax reciprocal): tight correctness check.
    out32 = jax.block_until_ready(
        vit_block(x, params, num_heads=H, matmul_dtype=jnp.float32))
    assert out32.shape == (B, T, E)
    err32 = float(jnp.max(jnp.abs(out32 - ref)))
    assert jnp.allclose(out32, ref, atol=2e-3, rtol=2e-3), f"f32 max abs err {err32}"

    # bf16 MXU path (default): looser check.
    out16 = jax.block_until_ready(vit_block(x, params, num_heads=H))
    assert out16.shape == (B, T, E)
    err16 = float(jnp.max(jnp.abs(out16 - ref)))
    assert jnp.allclose(out16, ref, atol=5e-2, rtol=5e-2), f"bf16 max abs err {err16}"

    print("KERNEL_OK")
</pallas_src>

<mosaic_0001>
module attributes {stable_mosaic.version = 11 : i64} {
  func.func @vit_block_kernel(%arg0: i32, %arg1: memref<1x16x64xf32, #tpu.memory_space<vmem>>, %arg2: memref<1x64xf32, #tpu.memory_space<vmem>>, %arg3: memref<1x64xf32, #tpu.memory_space<vmem>>, %arg4: memref<64x192xf32, #tpu.memory_space<vmem>>, %arg5: memref<1x192xf32, #tpu.memory_space<vmem>>, %arg6: memref<64x64xf32, #tpu.memory_space<vmem>>, %arg7: memref<1x64xf32, #tpu.memory_space<vmem>>, %arg8: memref<1x64xf32, #tpu.memory_space<vmem>>, %arg9: memref<1x64xf32, #tpu.memory_space<vmem>>, %arg10: memref<64x128xf32, #tpu.memory_space<vmem>>, %arg11: memref<1x128xf32, #tpu.memory_space<vmem>>, %arg12: memref<128x64xf32, #tpu.memory_space<vmem>>, %arg13: memref<1x64xf32, #tpu.memory_space<vmem>>, %arg14: memref<1x16x64xf32, #tpu.memory_space<vmem>>) attributes {dimension_semantics = [#tpu.dimension_semantics<parallel>], iteration_bounds = array<i64: 2>, scalar_prefetch = 0 : i64, scratch_operands = 0 : i64, tpu.core_type = #tpu.core_type<tc>, window_params = [{transform_indices = @transform_0, window_bounds = array<i64: 1, 16, 64>}, {pipeline_mode = #tpu.pipeline_mode<synchronous>, transform_indices = @transform_1, window_bounds = array<i64: 1, 64>}, {pipeline_mode = #tpu.pipeline_mode<synchronous>, transform_indices = @transform_2, window_bounds = array<i64: 1, 64>}, {pipeline_mode = #tpu.pipeline_mode<synchronous>, transform_indices = @transform_3, window_bounds = array<i64: 64, 192>}, {pipeline_mode = #tpu.pipeline_mode<synchronous>, transform_indices = @transform_4, window_bounds = array<i64: 1, 192>}, {pipeline_mode = #tpu.pipeline_mode<synchronous>, transform_indices = @transform_5, window_bounds = array<i64: 64, 64>}, {pipeline_mode = #tpu.pipeline_mode<synchronous>, transform_indices = @transform_6, window_bounds = array<i64: 1, 64>}, {pipeline_mode = #tpu.pipeline_mode<synchronous>, transform_indices = @transform_7, window_bounds = array<i64: 1, 64>}, {pipeline_mode = #tpu.pipeline_mode<synchronous>, transform_indices = @transform_8, window_bounds = array<i64: 1, 64>}, {pipeline_mode = #tpu.pipeline_mode<synchronous>, transform_indices = @transform_9, window_bounds = array<i64: 64, 128>}, {pipeline_mode = #tpu.pipeline_mode<synchronous>, transform_indices = @transform_10, window_bounds = array<i64: 1, 128>}, {pipeline_mode = #tpu.pipeline_mode<synchronous>, transform_indices = @transform_11, window_bounds = array<i64: 128, 64>}, {pipeline_mode = #tpu.pipeline_mode<synchronous>, transform_indices = @transform_12, window_bounds = array<i64: 1, 64>}, {transform_indices = @transform_13, window_bounds = array<i64: 1, 16, 64>}]} {
    %c0 = arith.constant 0 : index
    %c0_0 = arith.constant 0 : index
    %c0_1 = arith.constant 0 : index
    %0 = vector.load %arg1[%c0, %c0_0, %c0_1] : memref<1x16x64xf32, #tpu.memory_space<vmem>>, vector<1x16x64xf32>
    %1 = vector.shape_cast %0 : vector<1x16x64xf32> to vector<16x64xf32>
    %c0_2 = arith.constant 0 : index
    %c0_3 = arith.constant 0 : index
    %2 = vector.load %arg2[%c0_2, %c0_3] : memref<1x64xf32, #tpu.memory_space<vmem>>, vector<1x64xf32>
    %c0_4 = arith.constant 0 : index
    %c0_5 = arith.constant 0 : index
    %3 = vector.load %arg3[%c0_4, %c0_5] : memref<1x64xf32, #tpu.memory_space<vmem>>, vector<1x64xf32>
    %cst = arith.constant dense<0.000000e+00> : vector<16xf32>
    %4 = vector.multi_reduction <add>, %1, %cst [1] : vector<16x64xf32> to vector<16xf32>
    %5 = vector.shape_cast %4 : vector<16xf32> to vector<16x1xf32>
    %cst_6 = arith.constant 6.400000e+01 : f32
    %6 = vector.broadcast %cst_6 : f32 to vector<16x1xf32>
    %7 = arith.divf %5, %6 : vector<16x1xf32>
    %8 = vector.broadcast %7 : vector<16x1xf32> to vector<16x64xf32>
    %9 = arith.subf %1, %8 : vector<16x64xf32>
    %10 = arith.mulf %9, %9 : vector<16x64xf32>
    %cst_7 = arith.constant dense<0.000000e+00> : vector<16xf32>
    %11 = vector.multi_reduction <add>, %10, %cst_7 [1] : vector<16x64xf32> to vector<16xf32>
    %12 = vector.shape_cast %11 : vector<16xf32> to vector<16x1xf32>
    %cst_8 = arith.constant 6.400000e+01 : f32
    %13 = vector.broadcast %cst_8 : f32 to vector<16x1xf32>
    %14 = arith.divf %12, %13 : vector<16x1xf32>
    %15 = vector.broadcast %7 : vector<16x1xf32> to vector<16x64xf32>
    %16 = arith.subf %1, %15 : vector<16x64xf32>
    %cst_9 = arith.constant 9.99999997E-7 : f32
    %17 = vector.broadcast %cst_9 : f32 to vector<16x1xf32>
    %18 = arith.addf %14, %17 : vector<16x1xf32>
    %19 = math.sqrt %18 : vector<16x1xf32>
    %20 = vector.broadcast %19 : vector<16x1xf32> to vector<16x64xf32>
    %21 = arith.divf %16, %20 : vector<16x64xf32>
    %22 = vector.broadcast %2 : vector<1x64xf32> to vector<16x64xf32>
    %23 = arith.mulf %21, %22 : vector<16x64xf32>
    %24 = vector.broadcast %3 : vector<1x64xf32> to vector<16x64xf32>
    %25 = arith.addf %23, %24 : vector<16x64xf32>
    %c0_10 = arith.constant 0 : index
    %c0_11 = arith.constant 0 : index
    %26 = vector.load %arg4[%c0_10, %c0_11] : memref<64x192xf32, #tpu.memory_space<vmem>>, vector<64x192xf32>
    %cst_12 = arith.constant dense<0.000000e+00> : vector<16x192xf32>
    %27 = tpu.matmul %25, %26, %cst_12 {dimension_numbers = #tpu.dot_dimension_numbers<[1], [0], [0], [1], [0, 0, 1, 1], [], []>} : vector<16x64xf32>, vector<64x192xf32>, vector<16x192xf32> -> vector<16x192xf32>
    %c0_13 = arith.constant 0 : index
    %c0_14 = arith.constant 0 : index
    %28 = vector.load %arg5[%c0_13, %c0_14] : memref<1x192xf32, #tpu.memory_space<vmem>>, vector<1x192xf32>
    %29 = vector.broadcast %28 : vector<1x192xf32> to vector<16x192xf32>
    %30 = arith.addf %27, %29 : vector<16x192xf32>
    %31 = vector.extract_strided_slice %30 {offsets = [0, 0], sizes = [16, 64], strides = [1, 1]} : vector<16x192xf32> to vector<16x64xf32>
    %32 = vector.shape_cast %31 : vector<16x64xf32> to vector<16x4x16xf32>
    %33 = tpu.transpose %32, [1, 0, 2] : vector<16x4x16xf32> -> vector<4x16x16xf32>
    %34 = vector.extract_strided_slice %30 {offsets = [0, 64], sizes = [16, 64], strides = [1, 1]} : vector<16x192xf32> to vector<16x64xf32>
    %35 = vector.shape_cast %34 : vector<16x64xf32> to vector<16x4x16xf32>
    %36 = tpu.transpose %35, [1, 0, 2] : vector<16x4x16xf32> -> vector<4x16x16xf32>
    %37 = vector.extract_strided_slice %30 {offsets = [0, 128], sizes = [16, 64], strides = [1, 1]} : vector<16x192xf32> to vector<16x64xf32>
    %38 = vector.shape_cast %37 : vector<16x64xf32> to vector<16x4x16xf32>
    %39 = tpu.transpose %38, [1, 0, 2] : vector<16x4x16xf32> -> vector<4x16x16xf32>
    "tpu.trace_start"() <{level = 10 : i32, message = "hqd,hkd->hqk"}> : () -> ()
    %cst_15 = arith.constant dense<0.000000e+00> : vector<4x16x16xf32>
    %40 = tpu.matmul %33, %36, %cst_15 {dimension_numbers = #tpu.dot_dimension_numbers<[2], [2], [1], [1], [0, 0, 0, 1, 1, 1], [0], [0]>} : vector<4x16x16xf32>, vector<4x16x16xf32>, vector<4x16x16xf32> -> vector<4x16x16xf32>
    "tpu.trace_stop"() : () -> ()
    %41 = tpu.iota {dimensions = array<i32: 2>} : vector<1x1x16xi32>
    %c10_i32 = arith.constant 10 : i32
    %42 = vector.broadcast %c10_i32 : i32 to vector<1x1x16xi32>
    %43 = arith.cmpi slt, %41, %42 : vector<1x1x16xi32>
    %cst_16 = arith.constant -1.000000e+30 : f32
    %44 = vector.shape_cast %43 : vector<1x1x16xi1> to vector<1x1x16xi1>
    %45 = vector.broadcast %44 : vector<1x1x16xi1> to vector<4x16x16xi1>
    %46 = vector.broadcast %cst_16 : f32 to vector<4x16x16xf32>
    %47 = arith.select %45, %40, %46 : vector<4x16x16xi1>, vector<4x16x16xf32>
    %cst_17 = arith.constant dense<0xFF800000> : vector<4x16xf32>
    %48 = vector.multi_reduction <maximumf>, %47, %cst_17 [2] : vector<4x16x16xf32> to vector<4x16xf32>
    %49 = vector.shape_cast %48 : vector<4x16xf32> to vector<4x16x1xf32>
    %50 = vector.broadcast %49 : vector<4x16x1xf32> to vector<4x16x16xf32>
    %51 = arith.subf %47, %50 : vector<4x16x16xf32>
    %52 = math.exp %51 : vector<4x16x16xf32>
    %cst_18 = arith.constant dense<0.000000e+00> : vector<4x16xf32>
    %53 = vector.multi_reduction <add>, %52, %cst_18 [2] : vector<4x16x16xf32> to vector<4x16xf32>
    %54 = vector.shape_cast %53 : vector<4x16xf32> to vector<4x16x1xf32>
    "tpu.trace_start"() <{level = 10 : i32, message = "hqk,hkd->hqd"}> : () -> ()
    %cst_19 = arith.constant dense<0.000000e+00> : vector<4x16x16xf32>
    %55 = tpu.matmul %52, %39, %cst_19 {dimension_numbers = #tpu.dot_dimension_numbers<[2], [1], [1], [2], [0, 0, 0, 1, 1, 2], [0], [0]>} : vector<4x16x16xf32>, vector<4x16x16xf32>, vector<4x16x16xf32> -> vector<4x16x16xf32>
    "tpu.trace_stop"() : () -> ()
    %56 = tpu.reciprocal %54 : vector<4x16x1xf32> -> vector<4x16x1xf32>
    %57 = vector.broadcast %56 : vector<4x16x1xf32> to vector<4x16x16xf32>
    %58 = arith.mulf %55, %57 : vector<4x16x16xf32>
    %59 = tpu.transpose %58, [1, 0, 2] : vector<4x16x16xf32> -> vector<16x4x16xf32>
    %60 = vector.shape_cast %59 : vector<16x4x16xf32> to vector<16x64xf32>
    %c0_20 = arith.constant 0 : index
    %c0_21 = arith.constant 0 : index
    %61 = vector.load %arg6[%c0_20, %c0_21] : memref<64x64xf32, #tpu.memory_space<vmem>>, vector<64x64xf32>
    %cst_22 = arith.constant dense<0.000000e+00> : vector<16x64xf32>
    %62 = tpu.matmul %60, %61, %cst_22 {dimension_numbers = #tpu.dot_dimension_numbers<[1], [0], [0], [1], [0, 0, 1, 1], [], []>} : vector<16x64xf32>, vector<64x64xf32>, vector<16x64xf32> -> vector<16x64xf32>
    %c0_23 = arith.constant 0 : index
    %c0_24 = arith.constant 0 : index
    %63 = vector.load %arg7[%c0_23, %c0_24] : memref<1x64xf32, #tpu.memory_space<vmem>>, vector<1x64xf32>
    %64 = vector.broadcast %63 : vector<1x64xf32> to vector<16x64xf32>
    %65 = arith.addf %62, %64 : vector<16x64xf32>
    %66 = arith.addf %65, %25 : vector<16x64xf32>
    %c0_25 = arith.constant 0 : index
    %c0_26 = arith.constant 0 : index
    %67 = vector.load %arg8[%c0_25, %c0_26] : memref<1x64xf32, #tpu.memory_space<vmem>>, vector<1x64xf32>
    %c0_27 = arith.constant 0 : index
    %c0_28 = arith.constant 0 : index
    %68 = vector.load %arg9[%c0_27, %c0_28] : memref<1x64xf32, #tpu.memory_space<vmem>>, vector<1x64xf32>
    %cst_29 = arith.constant dense<0.000000e+00> : vector<16xf32>
    %69 = vector.multi_reduction <add>, %66, %cst_29 [1] : vector<16x64xf32> to vector<16xf32>
    %70 = vector.shape_cast %69 : vector<16xf32> to vector<16x1xf32>
    %cst_30 = arith.constant 6.400000e+01 : f32
    %71 = vector.broadcast %cst_30 : f32 to vector<16x1xf32>
    %72 = arith.divf %70, %71 : vector<16x1xf32>
    %73 = vector.broadcast %72 : vector<16x1xf32> to vector<16x64xf32>
    %74 = arith.subf %66, %73 : vector<16x64xf32>
    %75 = arith.mulf %74, %74 : vector<16x64xf32>
    %cst_31 = arith.constant dense<0.000000e+00> : vector<16xf32>
    %76 = vector.multi_reduction <add>, %75, %cst_31 [1] : vector<16x64xf32> to vector<16xf32>
    %77 = vector.shape_cast %76 : vector<16xf32> to vector<16x1xf32>
    %cst_32 = arith.constant 6.400000e+01 : f32
    %78 = vector.broadcast %cst_32 : f32 to vector<16x1xf32>
    %79 = arith.divf %77, %78 : vector<16x1xf32>
    %80 = vector.broadcast %72 : vector<16x1xf32> to vector<16x64xf32>
    %81 = arith.subf %66, %80 : vector<16x64xf32>
    %cst_33 = arith.constant 9.99999997E-7 : f32
    %82 = vector.broadcast %cst_33 : f32 to vector<16x1xf32>
    %83 = arith.addf %79, %82 : vector<16x1xf32>
    %84 = math.sqrt %83 : vector<16x1xf32>
    %85 = vector.broadcast %84 : vector<16x1xf32> to vector<16x64xf32>
    %86 = arith.divf %81, %85 : vector<16x64xf32>
    %87 = vector.broadcast %67 : vector<1x64xf32> to vector<16x64xf32>
    %88 = arith.mulf %86, %87 : vector<16x64xf32>
    %89 = vector.broadcast %68 : vector<1x64xf32> to vector<16x64xf32>
    %90 = arith.addf %88, %89 : vector<16x64xf32>
    %c0_34 = arith.constant 0 : index
    %c0_35 = arith.constant 0 : index
    %91 = vector.load %arg10[%c0_34, %c0_35] : memref<64x128xf32, #tpu.memory_space<vmem>>, vector<64x128xf32>
    %cst_36 = arith.constant dense<0.000000e+00> : vector<16x128xf32>
    %92 = tpu.matmul %90, %91, %cst_36 {dimension_numbers = #tpu.dot_dimension_numbers<[1], [0], [0], [1], [0, 0, 1, 1], [], []>} : vector<16x64xf32>, vector<64x128xf32>, vector<16x128xf32> -> vector<16x128xf32>
    %c0_37 = arith.constant 0 : index
    %c0_38 = arith.constant 0 : index
    %93 = vector.load %arg11[%c0_37, %c0_38] : memref<1x128xf32, #tpu.memory_space<vmem>>, vector<1x128xf32>
    %94 = vector.broadcast %93 : vector<1x128xf32> to vector<16x128xf32>
    %95 = arith.addf %92, %94 : vector<16x128xf32>
    %cst_39 = arith.constant 5.000000e-01 : f32
    %96 = vector.broadcast %cst_39 : f32 to vector<16x128xf32>
    %97 = arith.mulf %96, %95 : vector<16x128xf32>
    %cst_40 = arith.constant 0.707106769 : f32
    %98 = vector.broadcast %cst_40 : f32 to vector<16x128xf32>
    %99 = arith.mulf %95, %98 : vector<16x128xf32>
    %100 = math.erf %99 : vector<16x128xf32>
    %cst_41 = arith.constant 1.000000e+00 : f32
    %101 = vector.broadcast %cst_41 : f32 to vector<16x128xf32>
    %102 = arith.addf %101, %100 : vector<16x128xf32>
    %103 = arith.mulf %97, %102 : vector<16x128xf32>
    %c0_42 = arith.constant 0 : index
    %c0_43 = arith.constant 0 : index
    %104 = vector.load %arg12[%c0_42, %c0_43] : memref<128x64xf32, #tpu.memory_space<vmem>>, vector<128x64xf32>
    %cst_44 = arith.constant dense<0.000000e+00> : vector<16x64xf32>
    %105 = tpu.matmul %103, %104, %cst_44 {dimension_numbers = #tpu.dot_dimension_numbers<[1], [0], [0], [1], [0, 0, 1, 1], [], []>} : vector<16x128xf32>, vector<128x64xf32>, vector<16x64xf32> -> vector<16x64xf32>
    %c0_45 = arith.constant 0 : index
    %c0_46 = arith.constant 0 : index
    %106 = vector.load %arg13[%c0_45, %c0_46] : memref<1x64xf32, #tpu.memory_space<vmem>>, vector<1x64xf32>
    %107 = vector.broadcast %106 : vector<1x64xf32> to vector<16x64xf32>
    %108 = arith.addf %105, %107 : vector<16x64xf32>
    %109 = arith.addf %108, %90 : vector<16x64xf32>
    %c0_47 = arith.constant 0 : index
    %c0_48 = arith.constant 0 : index
    %c0_49 = arith.constant 0 : index
    %110 = vector.load %arg14[%c0_47, %c0_48, %c0_49] : memref<1x16x64xf32, #tpu.memory_space<vmem>>, vector<1x16x64xf32>
    %111 = vector.shape_cast %110 : vector<1x16x64xf32> to vector<16x64xf32>
    %112 = vector.shape_cast %109 : vector<16x64xf32> to vector<1x16x64xf32>
    tpu.vector_store %arg14[%c0_47, %c0_48, %c0_49], %112 {strides = array<i32>} : memref<1x16x64xf32, #tpu.memory_space<vmem>>, vector<1x16x64xf32>,
    return
  }
  func.func @transform_0(%arg0: i32) -> (i32, i32, i32) {
    %c0_i32 = arith.constant 0 : i32
    %c0_i32_0 = arith.constant 0 : i32
    %c0_i32_1 = arith.constant 0 : i32
    return %arg0, %c0_i32, %c0_i32_0 : i32, i32, i32
  }
  func.func @transform_1(%arg0: i32) -> (i32, i32) {
    %c0_i32 = arith.constant 0 : i32
    %c0_i32_0 = arith.constant 0 : i32
    %c0_i32_1 = arith.constant 0 : i32
    return %c0_i32, %c0_i32_0 : i32, i32
  }
  func.func @transform_2(%arg0: i32) -> (i32, i32) {
    %c0_i32 = arith.constant 0 : i32
    %c0_i32_0 = arith.constant 0 : i32
    %c0_i32_1 = arith.constant 0 : i32
    return %c0_i32, %c0_i32_0 : i32, i32
  }
  func.func @transform_3(%arg0: i32) -> (i32, i32) {
    %c0_i32 = arith.constant 0 : i32
    %c0_i32_0 = arith.constant 0 : i32
    %c0_i32_1 = arith.constant 0 : i32
    return %c0_i32, %c0_i32_0 : i32, i32
  }
  func.func @transform_4(%arg0: i32) -> (i32, i32) {
    %c0_i32 = arith.constant 0 : i32
    %c0_i32_0 = arith.constant 0 : i32
    %c0_i32_1 = arith.constant 0 : i32
    return %c0_i32, %c0_i32_0 : i32, i32
  }
  func.func @transform_5(%arg0: i32) -> (i32, i32) {
    %c0_i32 = arith.constant 0 : i32
    %c0_i32_0 = arith.constant 0 : i32
    %c0_i32_1 = arith.constant 0 : i32
    return %c0_i32, %c0_i32_0 : i32, i32
  }
  func.func @transform_6(%arg0: i32) -> (i32, i32) {
    %c0_i32 = arith.constant 0 : i32
    %c0_i32_0 = arith.constant 0 : i32
    %c0_i32_1 = arith.constant 0 : i32
    return %c0_i32, %c0_i32_0 : i32, i32
  }
  func.func @transform_7(%arg0: i32) -> (i32, i32) {
    %c0_i32 = arith.constant 0 : i32
    %c0_i32_0 = arith.constant 0 : i32
    %c0_i32_1 = arith.constant 0 : i32
    return %c0_i32, %c0_i32_0 : i32, i32
  }
  func.func @transform_8(%arg0: i32) -> (i32, i32) {
    %c0_i32 = arith.constant 0 : i32
    %c0_i32_0 = arith.constant 0 : i32
    %c0_i32_1 = arith.constant 0 : i32
    return %c0_i32, %c0_i32_0 : i32, i32
  }
  func.func @transform_9(%arg0: i32) -> (i32, i32) {
    %c0_i32 = arith.constant 0 : i32
    %c0_i32_0 = arith.constant 0 : i32
    %c0_i32_1 = arith.constant 0 : i32
    return %c0_i32, %c0_i32_0 : i32, i32
  }
  func.func @transform_10(%arg0: i32) -> (i32, i32) {
    %c0_i32 = arith.constant 0 : i32
    %c0_i32_0 = arith.constant 0 : i32
    %c0_i32_1 = arith.constant 0 : i32
    return %c0_i32, %c0_i32_0 : i32, i32
  }
  func.func @transform_11(%arg0: i32) -> (i32, i32) {
    %c0_i32 = arith.constant 0 : i32
    %c0_i32_0 = arith.constant 0 : i32
    %c0_i32_1 = arith.constant 0 : i32
    return %c0_i32, %c0_i32_0 : i32, i32
  }
  func.func @transform_12(%arg0: i32) -> (i32, i32) {
    %c0_i32 = arith.constant 0 : i32
    %c0_i32_0 = arith.constant 0 : i32
    %c0_i32_1 = arith.constant 0 : i32
    return %c0_i32, %c0_i32_0 : i32, i32
  }
  func.func @transform_13(%arg0: i32) -> (i32, i32, i32) {
    %c0_i32 = arith.constant 0 : i32
    %c0_i32_0 = arith.constant 0 : i32
    %c0_i32_1 = arith.constant 0 : i32
    return %arg0, %c0_i32, %c0_i32_0 : i32, i32, i32
  }
}

</mosaic_0001>

<bundles_post_ra>
// kernel: tpu_custom_call.1
= control target key start
LH: loop header
LB: loop body
LE: loop exit
PB: predicated region body
PF: predicated region fallthrough
CT: control target
= control target key end

     0   :  { %s4030_s0 = inlined_call_operand.hbm [shape: f32[2,16,64], index: 0, kind: input, shape index: {}]   ;;  %s4031_s1 = inlined_call_operand.hbm [shape: f32[1,64], index: 1, kind: input, shape index: {}]   ;;  %s4032_s2 = inlined_call_operand.hbm [shape: f32[1,64], index: 2, kind: input, shape index: {}]   ;;  %s4033_s3 = inlined_call_operand.vmem [shape: f32[64,192], index: 3, kind: input, shape index: {}]   ;;  %s4034_s4 = inlined_call_operand.vmem [shape: f32[1,192], index: 4, kind: input, shape index: {}]   ;;  %s4035_s5 = inlined_call_operand.vmem [shape: f32[64,64], index: 5, kind: input, shape index: {}]   ;;  %s4036_s6 = inlined_call_operand.vmem [shape: f32[1,64], index: 6, kind: input, shape index: {}]   ;;  %s4037_s7 = inlined_call_operand.vmem [shape: f32[1,64], index: 7, kind: input, shape index: {}]   ;;  %s4038_s8 = inlined_call_operand.vmem [shape: f32[1,64], index: 8, kind: input, shape index: {}]   ;;  %s4039_s9 = inlined_call_operand.hbm [shape: f32[64,128], index: 9, kind: input, shape index: {}]   ;;  %s4040_s10 = inlined_call_operand.vmem [shape: f32[1,128], index: 10, kind: input, shape index: {}]   ;;  %s4041_s11 = inlined_call_operand.vmem [shape: f32[128,64], index: 11, kind: input, shape index: {}]   ;;  %s4042_s12 = inlined_call_operand.vmem [shape: f32[1,64], index: 12, kind: input, shape index: {}]   ;;  %s4043_s13 = inlined_call_operand.hbm [shape: f32[2,16,64], index: 13, kind: output, shape index: {}]  }
   0x1   :  { %4050 = sst [smem:[#allocation19_spill]] %s4031_s1 }
   0x2   :  { %4051 = sst [smem:[#allocation20_spill]] %s4032_s2 }
   0x3   :  { %4052 = sst [smem:[#allocation21_spill]] %s4039_s9 }
   0x4   :  { %18 = vsyncpa [#allocation3], 0 }
   0x5   :  { %20 = vsyncpa [#allocation3 + $0x1], 0 }
   0x6   :  { %21 = vsyncpa [#allocation6], 0 }
   0x7   :  { %22 = vsyncpa [#allocation9], 0 }
   0x8   :  { %23 = vsyncpa [#allocation4], 0 }
   0x9   :  { %25 = vsyncpa [#allocation4 + $0x1], 0  ;;  %s3049_s25 = smov 0   ;;  %s3051_s26 = smov 0  }
   0xa   :  { %s3053_s27 = smov 0   ;;  %s3055_s28 = smov 0  }
   0xb LB: > { %4053 = sst [smem:[#allocation15_spill]] %s2956_s27  ;;  %s3070_s29 = sadd.s32 4294967295, %s2960_s28   ;;  %s2960_s28 = sphi %s3055_s28, %s4076_s28   ;;  %s2956_s27 = sphi %s3053_s27, %s4078_s27   ;;  %s2952_s26 = sphi %s3051_s26, %s4080_s26   ;;  %s2948_s25 = sphi %s3049_s25, %s4079_s25  }
   0xc   : > { %s2543_s30 = sadd.s32 4294967294, %s2960_s28   ;;  %p51_p0 = scmp.ne.s32.totalorder %s2952_s26, %s2948_s25 }
   0xd   : > { %p52_p1 = scmp.eq.s32.totalorder %s3070_s29, 0  ;;  %p327_p2 = scmp.eq.s32.totalorder %s3070_s29, 1 }
   0xe   : > { %p333_p3 = scmp.eq.s32.totalorder %s2543_s30, 1  ;;  %p2544_p5 = scmp.ge.s32.totalorder %s2960_s28, 1 }
   0xf   : > { %p3079_p4 = por %p52_p1, %p51_p0  ;;  %p340_p7 = scmp.lt.s32.totalorder %s2960_s28, 3 }
  0x10   : > { %p3084_p6 = por %p333_p3, %p51_p0  ;;  %s4057_s1 = sld [smem:[#allocation19_spill]] }
  0x11   : > { %p3092_p8 = pnand %p2544_p5, %p340_p7  ;;  %s2962_s20 = smov [#allocation5]  }
  0x12   : > { %s4055_s15 = scalar_select %p3084_p6, 1, 0 }
  0x13   : > { %p2615_p10 = pneg %p3092_p8  ;;  %s354_s21 = sshll.u32 %s2962_s20, 4  ;;  %s355_s21 = int_to_ptr.vmem [resolvable:$true] %s354_s21 }
  0x14   : > { %4056 = sst [smem:[#allocation16_spill]] %s4055_s15  ;;  %s2964_s23 = smov [#allocation8]  }
  0x15   : > { %s4059_s2 = sld [smem:[#allocation20_spill]]  ;;  %p3104_p11 = pnand %p2615_p10, %p52_p1 }
  0x16   : > { %s352_s18 = sshll.u32 %s4057_s1, 4  ;;  %s4061_s9 = sld [smem:[#allocation21_spill]]  ;;  %s353_s18 = int_to_ptr.hbm [resolvable:$true] %s352_s18 }
  0x17   : > { %s2963_s1 = smov [#allocation7]   ;;  %s395_s16 = sshll.u32 %s2964_s23, 4  ;;  %s396_s16 = int_to_ptr.vmem [resolvable:$true] %s395_s16 }
  0x18   : > { %s366_s22 = sshll.u32 %s2963_s1, 4  ;;  %s4044_s17 = smov 128   ;;  %s367_s22 = int_to_ptr.vmem [resolvable:$true] %s366_s22 }
  0x19   : > { %2618 = dma.hbm_to_vmem [thread:$0]  (!%p3104_p11), %s353_s18, 16, %s355_s21, [#allocation6]  }
  0x1a   : > { %s3121_s1 = sadd.s32 1, %s2960_s28   ;;  %s38_s21 = sadd.s32 1, %s2956_s27 }
  0x1b   : > { %s364_s24 = sshll.u32 %s4059_s2, 4  ;;  %s4045_s2 = smov 8   ;;  %s365_s24 = int_to_ptr.hbm [resolvable:$true] %s364_s24 }
  0x1c   : > { %s393_s20 = sshll.u32 %s4061_s9, 4  ;;  %4062 = sst [smem:[#allocation17_spill]] %s3121_s1  ;;  %s394_s20 = int_to_ptr.hbm [resolvable:$true] %s393_s20 }
  0x1d   : > { %2621 = dma.hbm_to_vmem [thread:$0]  (!%p3104_p11), %s365_s24, 16, %s367_s22, [#allocation6]  }
  0x1e   : > { %2624 = dma.hbm_to_vmem [thread:$0]  (!%p3104_p11), %s394_s20, 1024, %s396_s16, [#allocation9], %s4044_s17, %s4044_s17, %s4045_s2  }
  0x1f   : > { %s35_s18 = ssub.s32 %s2960_s28, %s3121_s1  ;;  %p45_p13 = scmp.ne.s32.totalorder %s2956_s27, %s2952_s26 }
  0x20   : > { %p36_p12 = scmp.eq.s32.totalorder %s35_s18, 0  ;;  %p46_p0 = scmp.eq.s32.totalorder %s2960_s28, 0 }
  0x21   : > { %p3134_p3 = por %p327_p2, %p45_p13  ;;  %p2636_p5 = scmp.lt.s32.totalorder %s2960_s28, 2 }
  0x22   : > { %s3130_s24 = scalar_select %p36_p12, %s2956_s27, %s38_s21  }
  0x23   : > { %s418_s30 = sand.u32 1, %s2956_s27   ;;  %s2597_s23 = sshll.u32 %s2960_s28, 4 }
  0x24   : > { %4063 = sst [smem:[#allocation18_spill]] %s3130_s24  ;;  %p47_p7 = por %p46_p0, %p45_p13 }
  0x25   : > { %s2549_s20 = sshll.u32 %s418_s30, 4  ;;  %s427_s2 = scalar_lea.hbm %s4030_s0, %s2597_s23 }
  0x26   : > { %s428_s9 = sshll.u32 %s427_s2, 4  ;;  %s422_s18 = scalar_lea.vmem [#allocation2], %s2549_s20  ;;  %s429_s9 = int_to_ptr.hbm [resolvable:$true] %s428_s9 }
  0x27   : > { %s430_s1 = sshll.u32 %s422_s18, 4  ;;  %p3144_p10 = pnand %p2636_p5, %p47_p7  ;;  %s431_s1 = int_to_ptr.vmem [resolvable:$true] %s430_s1 }
  0x28   : > { %s419_s24 = scalar_lea.sflag [#allocation3], %s418_s30  ;;  %s2856_s15 = sshra.s32 %s429_s9, 4  ;;  %s2857_s15 = int_to_ptr.hbm [resolvable:$true] %s2856_s15 }
  0x29   : > { %s2858_s27 = scalar_lea.hbm %s2857_s15, 16  ;;  %p2860_p11 = pneg %p3144_p10 }
  0x2a   : > { %p2859_p2 = scmp.ne.s32.totalorder %s2857_s15, %s2858_s27  ;;  %s2863_s23 = scalar_lea.hbm %s4030_s0, 32 }
  0x2b   : > { %p2864_p0 = scmp.lt.s32.totalorder %s2857_s15, %s4030_s0  ;;  %p2865_p5 = scmp.lt.s32.totalorder %s2863_s23, %s2858_s27 }
  0x2c   : > { %p2861_p12 = pnand %p2860_p11, %p2859_p2 }
  0x2d   : > { %p2866_p7 = por %p2865_p5, %p2864_p0 }
  0x2e   : > { %p2862_p13 = pneg %p2861_p12 }
  0x30   : > { %p2867_p9 = pnand %p2866_p7, %p2862_p13 }
  0x32   : > { %2870 = shalt.err (!%p2867_p9)
}
  0x33   : > { %s4066_s30 = smov 8   ;;  %s4067_s18 = smov 128  }
  0x34   : > { %2628 = dma.hbm_to_vmem [thread:$0]  (!%p3144_p10), %s429_s9, 256, %s431_s1, %s419_s24, %s4067_s18, %s4067_s18, %s4066_s30  }
  0x35   : > { %442 = sbr.rel (%p3092_p8) target bundleno = 2096 (0x830), region = 72  ;;  %s3164_s17 = sand.u32 (!%p3092_p8), 1, %s2952_s26  }
  0x36   : > { %s2553_s27 = sshll.u32 (!%p3092_p8), %s3164_s17, 4  ;;  %s445_s15 = scalar_lea.sflag (!%p3092_p8), [#allocation3], %s3164_s17 }
  0x37   : > { %s448_s2 = scalar_lea.vmem (!%p3092_p8), [#allocation2], %s2553_s27 }
  0x3a   : > { %2931 = dma.done.wait (%p3079_p4), %s445_s15, 256  }
  0x3b   : > { %2933 = vsyncadd (%p3079_p4), %s445_s15, 4294967040 }
  0x3c   : > { %2935 = dma.done.wait (%p52_p1), [#allocation6], 32  }
  0x3d   : > { %2937 = vsyncadd (%p52_p1), [#allocation6], 4294967264 }
  0x3e   : > { %2939 = dma.done.wait (%p52_p1), [#allocation9], 1024  }
  0x3f   : > { %2941 = vsyncadd (%p52_p1), [#allocation9], 4294966272  ;;  %vm511_vm0 = vcmask 523264   ;;  %v507_v0 = vld [vmem:[%s448_s2] sm:$0xff]  ;;  %v508_v2 = vld [vmem:[%s448_s2 + $0x8] sm:$0xff]  ;;  %v2967_v4 = vmov 64.0  }
  0x40   : > { %v512_v1 = vsel %vm511_vm0, %v507_v0, 0.0  ;;  %v515_v3 = vsel %vm511_vm0, %v508_v2, 0.0  ;;  %2712 = vrcp.f32 %v2967_v4  ;;  %v619_v21 = vld [vmem:[%s4033_s3 + $0x70] sm:$0xff]  ;;  %v620_v22 = vld [vmem:[%s4033_s3 + $0x78] sm:$0xff]  ;;  %v617_v23 = vld [vmem:[%s4033_s3 + $0x60] sm:$0xff]  ;;  %s2968_s16 = smov 112  }
  0x41   : > { %513 = vadd.xlane.f32.xlu0 %v512_v1  ;;  %641 = vmatpush.msra.mxu0 %v619_v21  ;;  %v618_v24 = vld [vmem:[%s4033_s3 + $0x68] sm:$0xff]  ;;  %v615_v25 = vld [vmem:[%s4033_s3 + $0x50] sm:$0xff]  ;;  %v616_v26 = vld [vmem:[%s4033_s3 + $0x58] sm:$0xff]  ;;  %s2969_s30 = smov 64   ;;  %s2970_s18 = smov 80   ;;  %vm700_vm14 = vcmask 1047556  }
  0x42   : > { %664 = vmatpush.msra.mxu1 %v620_v22  ;;  %v613_v27 = vld [vmem:[%s4033_s3 + $0x40] sm:$0xff]  ;;  %v614_v28 = vld [vmem:[%s4033_s3 + $0x48] sm:$0xff]  ;;  %v611_v30 = vld [vmem:[%s4033_s3 + $0x30] sm:$0xff]  ;;  %s2971_s15 = smov 96   ;;  %vm1404_vm15 = vcmask 130048   ;;  %s2974_s2 = smov 48  }
  0x43   : > { %642 = vmatpush.msra.mxu0 %v617_v23  ;;  %v612_v31 = vld [vmem:[%s4033_s3 + $0x38] sm:$0xff]  ;;  %v609_v33 = vld [vmem:[%s4033_s3 + $0x20] sm:$0xff]  ;;  %v610_v34 = vld [vmem:[%s4033_s3 + $0x28] sm:$0xff]  ;;  %s2975_s9 = smov 32   ;;  %s2976_s14 = smov 16  }
  0x44   : > { %665 = vmatpush.msra.mxu1 %v618_v24  ;;  %v607_v36 = vld [vmem:[%s4033_s3 + $0x10] sm:$0xff]  ;;  %v608_v37 = vld [vmem:[%s4033_s3 + $0x18] sm:$0xff]  ;;  %v605_v38 = vld [vmem:[%s4033_s3] sm:$0xff]  ;;  %s2906_s21 = scalar_lea.hbm %s4043_s13, 32 }
  0x45   : > { %643 = vmatpush.msra.mxu0 %v615_v25  ;;  %v606_v39 = vld [vmem:[%s4033_s3 + $0x8] sm:$0xff] }
  0x46   : > { %v2713_v5 = vpop.eup %2712  ;;  %666 = vmatpush.msra.mxu1 %v616_v26 }
  0x47   : > { %v519_v6 = vmul.f32 64.0, %v2713_v5  ;;  %vm523_vm1 = vweird.f32 %v2713_v5  ;;  %644 = vmatpush.msra.mxu0 %v613_v27 }
  0x48   : > { %667 = vmatpush.msra.mxu1 %v614_v28 }
  0x49   : > { %516 = vadd.xlane.f32.xlu0 %v515_v3  ;;  %v520_v7 = vsub.f32 1.0, %v519_v6  ;;  %645 = vmatpush.msra.mxu0 %v611_v30 }
  0x4a   : > { %668 = vmatpush.msra.mxu1 %v612_v31 }
  0x4b   : > { %v521_v8 = vmul.f32 %v2713_v5, %v520_v7  ;;  %646 = vmatpush.msra.mxu0 %v609_v33 }
  0x4c   : > { %669 = vmatpush.msra.mxu1 %v610_v34 }
  0x4d   : > { %v522_v9 = vadd.f32 %v2713_v5, %v521_v8  ;;  %647 = vmatpush.msra.mxu0 %v607_v36 }
  0x4e   : > { %670 = vmatpush.msra.mxu1 %v608_v37  ;;  %v2972_v37 = vmov 1983009808  }
  0x4f   : > { %v3184_v10 = vsel %vm523_vm1, %v2713_v5, %v522_v9  ;;  %648 = vmatpush.msra.mxu0 %v605_v38  ;;  %v2705_v9 = vld [vmem:[#allocation5] ss:$0 sm:$0xff]  ;;  %v705_v38 = vunpack.c.l.s4 %v2972_v37 }
  0x50   : > { %671 = vmatpush.msra.mxu1 %v606_v39 }
  0xb4   : > { %v514_v11 = vpop.xlane.xlu0 %513 }
  0xb5   : > { %v525_v12 = vmul.f32 %v3184_v10, %v514_v11 }
  0xb7   : > { %v3187_v13 = vsub.f32 %v507_v0, %v525_v12 }
  0xb9   : > { %v529_v14 = vmul.f32 %v3187_v13, %v3187_v13 }
  0xbb   : > { %v531_v15 = vsel %vm511_vm0, %v529_v14, 0.0 }
  0xbc   : > { %532 = vadd.xlane.f32.xlu1 %v531_v15  ;;  %v517_v16 = vpop.xlane.xlu0 %516  ;;  %v2706_v15 = vld [vmem:[#allocation7] ss:$0 sm:$0xff] }
  0xbd   : > { %v526_v17 = vmul.f32 %v3184_v10, %v517_v16 }
  0xbf   : > { %v3193_v18 = vsub.f32 %v508_v2, %v526_v17 }
  0xc1   : > { %v530_v19 = vmul.f32 %v3193_v18, %v3193_v18 }
  0xc3   : > { %v534_v20 = vsel %vm511_vm0, %v530_v19, 0.0 }
  0xc4   : > { %535 = vadd.xlane.f32.xlu1 %v534_v20 }
 0x12f   : > { %v533_v29 = vpop.xlane.xlu1 %532 }
 0x130   : > { %v537_v32 = vmul.f32 %v533_v29, %v3184_v10  ;;  %v621_v29 = vld [vmem:[%s4034_s4] sm:$0x3] }
 0x131   : > { %v623_v30 = vperm.slane %v621_v29, 0 }
 0x132   : > { %v539_v35 = vadd.f32 1e-06, %v537_v32 }
 0x134   : > { %2714 = vrsqrt.f32 %v539_v35  ;;  %vm548_vm2 = vcmp.eq.f32.partialorder %v539_v35, inf  ;;  %v551_v53 = vand.u32 2147483648, %v539_v35  ;;  %vm550_vm3 = vcmp.eq.f32.partialorder %v539_v35, 0.0 }
 0x137   : > { %v536_v40 = vpop.xlane.xlu1 %535 }
 0x138   : > { %v538_v41 = vmul.f32 %v536_v40, %v3184_v10 }
 0x13a   : > { %v2715_v42 = vpop.eup %2714  ;;  %v540_v43 = vadd.f32 1e-06, %v538_v41 }
 0x13b   : > { %v542_v44 = vmul.f32 %v2715_v42, %v539_v35 }
 0x13c   : > { %2716 = vrsqrt.f32 %v540_v43  ;;  %vm560_vm4 = vcmp.eq.f32.partialorder %v540_v43, inf  ;;  %v563_v60 = vand.u32 2147483648, %v540_v43  ;;  %vm562_vm5 = vcmp.eq.f32.partialorder %v540_v43, 0.0 }
 0x13d   : > { %v543_v45 = vmul.f32 %v2715_v42, %v542_v44  ;;  %v3275_v44 = vunpack.c.0.s8 %v705_v38 }
 0x13f   : > { %v544_v46 = vmul.f32 0.5, %v543_v45 }
 0x141   : > { %v545_v47 = vsub.f32 1.5, %v544_v46 }
 0x142   : > { %v2717_v48 = vpop.eup %2716 }
 0x143   : > { %v554_v49 = vmul.f32 %v2717_v48, %v540_v43  ;;  %v546_v50 = vmul.f32 %v2715_v42, %v545_v47  ;;  %v624_v42 = vperm.slane %v621_v29, 1 }
 0x145   : > { %v555_v51 = vmul.f32 %v2717_v48, %v554_v49  ;;  %v547_v52 = vmul.f32 %v546_v50, %v539_v35 }
 0x147   : > { %v556_v54 = vmul.f32 0.5, %v555_v51  ;;  %v549_v55 = vsel %vm548_vm2, %v539_v35, %v547_v52 }
 0x148   : > { %v552_v56 = vsel %vm550_vm3, %v551_v53, %v549_v55 }
 0x149   : > { %v557_v57 = vsub.f32 1.5, %v556_v54  ;;  %2718 = vrcp.f32 %v552_v56  ;;  %v576_v2 = vand.u32 2147483648, %v552_v56  ;;  %v574_v4 = vand.u32 2147483647, %v552_v56 }
 0x14a   : > { %vm570_vm7 = vweird.f32 %v552_v56  ;;  %v2973_v54 = vmov 1934713408  }
 0x14b   : > { %v558_v58 = vmul.f32 %v2717_v48, %v557_v57  ;;  %v577_v7 = vor.u32 1.1754944e-38, %v576_v2  ;;  %vm575_vm9 = vcmp.eq.f32.partialorder %v574_v4, 8.507059e+37  ;;  %v729_v55 = vunpack.c.l.s4 %v2973_v54 }
 0x14d   : > { %v559_v59 = vmul.f32 %v558_v58, %v540_v43 }
 0x14f   : > { %v2719_v61 = vpop.eup %2718  ;;  %v561_v62 = vsel %vm560_vm4, %v540_v43, %v559_v59 }
 0x150   : > { %v566_v63 = vmul.f32 %v2719_v61, %v552_v56  ;;  %v564_v0 = vsel %vm562_vm5, %v563_v60, %v561_v62  ;;  %vm571_vm6 = vweird.f32 %v2719_v61 }
 0x151   : > { %2720 = vrcp.f32 %v564_v0  ;;  %vm572_vm8 = vmor %vm570_vm7, %vm571_vm6  ;;  %v591_v17 = vand.u32 2147483648, %v564_v0  ;;  %v589_v21 = vand.u32 2147483647, %v564_v0  ;;  %vm585_vm11 = vweird.f32 %v564_v0 }
 0x152   : > { %v567_v1 = vsub.f32 1.0, %v566_v63 }
 0x153   : > { %v592_v24 = vor.u32 1.1754944e-38, %v591_v17  ;;  %vm590_vm13 = vcmp.eq.f32.partialorder %v589_v21, 8.507059e+37 }
 0x154   : > { %v568_v3 = vmul.f32 %v2719_v61, %v567_v1  ;;  %v3295_v1 = vunpack.c.0.s8 %v729_v55 }
 0x156   : > { %v569_v5 = vadd.f32 %v2719_v61, %v568_v3 }
 0x157   : > { %v2721_v6 = vpop.eup %2720 }
 0x158   : > { %v573_v8 = vsel %vm572_vm8, %v2719_v61, %v569_v5  ;;  %v581_v11 = vmul.f32 %v2721_v6, %v564_v0  ;;  %vm586_vm10 = vweird.f32 %v2721_v6 }
 0x159   : > { %v578_v12 = vsel %vm575_vm9, %v577_v7, %v573_v8  ;;  %vm587_vm12 = vmor %vm585_vm11, %vm586_vm10 }
 0x15a   : > { %v579_v14 = vmul.f32 %v578_v12, %v3187_v13  ;;  %v582_v16 = vsub.f32 1.0, %v581_v11 }
 0x15c   : > { %v598_v19 = vmul.f32 %v2705_v9, %v579_v14  ;;  %v583_v20 = vmul.f32 %v2721_v6, %v582_v16 }
 0x15e   : > { %v3249_v22 = vadd.f32 %v2706_v15, %v598_v19  ;;  %v584_v23 = vadd.f32 %v2721_v6, %v583_v20 }
 0x160   : > { %2558 = vmatmul.msk.f32.vlgmr.msra.gmra.mxu0 %vm511_vm0, %v3249_v22  ;;  %2560 = vmatmul.msk.f32.vlgmr.msra.gmra.mxu1 %vm511_vm0, %v3249_v22  ;;  %v588_v13 = vsel %vm587_vm12, %v2721_v6, %v584_v23 }
 0x161   : > { %v593_v25 = vsel %vm590_vm13, %v592_v24, %v588_v13 }
 0x162   : > { %v594_v26 = vmul.f32 %v593_v25, %v3193_v18 }
 0x164   : > { %v599_v27 = vmul.f32 %v2705_v9, %v594_v26 }
 0x166   : > { %v3256_v28 = vadd.f32 %v2706_v15, %v599_v27 }
 0x168   : > { %2559 = vmatmul.msk.f32.gmra.mxu0 %vm511_vm0, %v3256_v28  ;;  %2561 = vmatmul.msk.f32.gmra.mxu1 %vm511_vm0, %v3256_v28 }
 0x1dd   : > { %v650_v31 = vpop.f32.mrf.mxu0  ;;  %v673_v35 = vpop.f32.mrf.mxu1 }
 0x1de   : > { %v651_v32 = vadd.f32 %v650_v31, %v623_v30  ;;  %v3286_v56 = vadd.f32 %v673_v35, %v624_v42 }
 0x1e0   : > { %681 = vrot.lane.b32.xlu1 %v651_v32, %s2968_s16  ;;  %v702_v47 = vrot.slane %v651_v32, 4 }
 0x1e5   : > { %v653_v18 = vpop.f32.mrf.mxu0  ;;  %v676_v43 = vpop.f32.mrf.mxu1 }
 0x1e6   : > { %v654_v33 = vadd.f32 %v653_v18, %v623_v30  ;;  %v3281_v50 = vadd.f32 %v676_v43, %v624_v42 }
 0x1e8   : > { %920 = vrot.lane.b32.xlu1 %v651_v32, %s2969_s30  ;;  %695 = vrot.lane.b32.xlu0 %v654_v33, %s2970_s18  ;;  %v758_v40 = vrot.slane %v654_v33, 4  ;;  %v3293_v63 = vpack.i.bf16 %v3286_v56, %v3281_v50 }
 0x1e9   : > { %683 = vrot.lane.b32.xlu2 %v654_v33, %s2968_s16 }
 0x1f1   : > { %689 = vrot.lane.b32.xlu2 %v654_v33, %s2971_s15 }
 0x1f9   : > { %687 = vrot.lane.b32.xlu2 %v651_v32, %s2971_s15 }
 0x201   : > { %693 = vrot.lane.b32.xlu2 %v651_v32, %s2970_s18 }
 0x209   : > { %922 = vrot.lane.b32.xlu2 %v654_v33, %s2969_s30 }
 0x243   : > { %v684_v34 = vpop.permute.xlu2 %683 }
 0x244   : > { %926 = vrot.lane.b32.xlu0 %v684_v34, %s2969_s30  ;;  %v770_v58 = vrot.slane %v684_v34, 4 }
 0x24b   : > { %v690_v36 = vpop.permute.xlu2 %689 }
 0x24c   : > { %930 = vrot.lane.b32.xlu2 %v690_v36, %s2969_s30  ;;  %v756_v39 = vrot.slane %v690_v36, 4  ;;  %v759_v46 = vsel %vm700_vm14, %v690_v36, %v758_v40 }
 0x24d   : > { %v767_v53 = vperm.slane %v759_v46, %v3275_v44 }
 0x24e   : > { %v757_v49 = vsel %vm700_vm14, %v756_v39, %v654_v33 }
 0x24f   : > { %v763_v57 = vperm.slane %v757_v49, %v3275_v44  ;;  %v794_v0 = vrot.slane %v767_v53, 4 }
 0x251   : > { %v782_v5 = vrot.slane %v763_v57, 4 }
 0x252   : > { %v682_v41 = vpop.permute.xlu1 %681 }
 0x253   : > { %v688_v45 = vpop.permute.xlu2 %687  ;;  %v714_v61 = vrot.slane %v682_v41, 4 }
 0x254   : > { %v699_v48 = vrot.slane %v688_v45, 4  ;;  %928 = vrot.lane.b32.xlu1 %v688_v45, %s2969_s30  ;;  %924 = vrot.lane.b32.xlu2 %v682_v41, %s2969_s30  ;;  %v703_v52 = vsel %vm700_vm14, %v688_v45, %v702_v47 }
 0x255   : > { %v711_v60 = vperm.slane %v703_v52, %v3275_v44 }
 0x256   : > { %v701_v51 = vsel %vm700_vm14, %v699_v48, %v651_v32 }
 0x257   : > { %v707_v59 = vperm.slane %v701_v51, %v3275_v44  ;;  %v738_v11 = vrot.slane %v711_v60, 4 }
 0x259   : > { %v726_v9 = vrot.slane %v707_v59, 4 }
 0x25a   : > { %v696_v62 = vpop.permute.xlu0 %695 }
 0x25b   : > { %v768_v2 = vrot.slane %v696_v62, 4  ;;  %v771_v3 = vsel %vm700_vm14, %v696_v62, %v770_v58  ;;  %v694_v4 = vpop.permute.xlu2 %693  ;;  %934 = vrot.lane.b32.xlu0 %v696_v62, %s2969_s30 }
 0x25c   : > { %v779_v6 = vperm.slane %v771_v3, %v3275_v44  ;;  %v712_v7 = vrot.slane %v694_v4, 4  ;;  %v715_v8 = vsel %vm700_vm14, %v694_v4, %v714_v61  ;;  %2696 = vrot.lane.b32.xlu1 %v3293_v63, %s2971_s15  ;;  %2691 = vrot.lane.b32.xlu2 %v3293_v63, %s2968_s16  ;;  %s2598_s16 = sshll.u32 %s3070_s29, 4  ;;  %s2426_s29 = scalar_lea.sflag [#allocation4], %s3164_s17 }
 0x25d   : > { %v769_v12 = vsel %vm700_vm14, %v768_v2, %v684_v34  ;;  %v723_v14 = vperm.slane %v715_v8, %v3275_v44 }
 0x25e   : > { %v775_v15 = vperm.slane %v769_v12, %v3275_v44  ;;  %v792_v16 = vrot.slane %v779_v6, 4  ;;  %v795_v17 = vsel %vm700_vm14, %v779_v6, %v794_v0  ;;  %v713_v19 = vsel %vm700_vm14, %v712_v7, %v682_v41 }
 0x25f   : > { %v803_v20 = vperm.slane %v795_v17, %v3295_v1  ;;  %v719_v21 = vperm.slane %v713_v19, %v3275_v44  ;;  %v736_v23 = vrot.slane %v723_v14, 4  ;;  %v739_v24 = vsel %vm700_vm14, %v723_v14, %v738_v11 }
 0x260   : > { %v780_v13 = vrot.slane %v775_v15, 4  ;;  %v783_v25 = vsel %vm700_vm14, %v775_v15, %v782_v5  ;;  %v793_v26 = vsel %vm700_vm14, %v792_v16, %v767_v53  ;;  %v747_v27 = vperm.slane %v739_v24, %v3295_v1 }
 0x261   : > { %v791_v29 = vperm.slane %v783_v25, %v3295_v1  ;;  %v799_v30 = vperm.slane %v793_v26, %v3295_v1  ;;  %v810_v31 = vrot.slane %v803_v20, 4  ;;  %v724_v32 = vrot.slane %v719_v21, 4 }
 0x262   : > { %v781_v18 = vsel %vm700_vm14, %v780_v13, %v763_v57  ;;  %v727_v33 = vsel %vm700_vm14, %v719_v21, %v726_v9  ;;  %v737_v34 = vsel %vm700_vm14, %v736_v23, %v711_v60  ;;  %v754_v35 = vrot.slane %v747_v27, 4 }
 0x263   : > { %v787_v36 = vperm.slane %v781_v18, %v3295_v1  ;;  %v806_v37 = vrot.slane %v791_v29, 4  ;;  %v808_v38 = vrot.slane %v799_v30, 4  ;;  %v811_v39 = vsel %vm700_vm14, 0.0, %v810_v31  ;;  %932 = vrot.lane.b32.xlu0 %v694_v4, %s2969_s30  ;;  %s506_s30 = scalar_lea.vmem [#allocation10], %s2553_s27 }
 0x264   : > { %v877_v40 = vsel %vm700_vm14, %v810_v31, %v799_v30  ;;  %v725_v41 = vsel %vm700_vm14, %v724_v32, %v707_v59  ;;  %v735_v42 = vperm.slane %v727_v33, %v3295_v1  ;;  %v882_v45 = vrot.slane %v811_v39, 4 }
 0x265   : > { %v807_v43 = vsel %vm700_vm14, 0.0, %v806_v37  ;;  %v731_v46 = vperm.slane %v725_v41, %v3295_v1  ;;  %v743_v47 = vperm.slane %v737_v34, %v3295_v1  ;;  %v809_v48 = vsel %vm700_vm14, 0.0, %v808_v38 }
 0x266   : > { %v750_v49 = vrot.slane %v735_v42, 4  ;;  %v755_v51 = vsel %vm700_vm14, 0.0, %v754_v35  ;;  %v804_v52 = vrot.slane %v787_v36, 4  ;;  %v866_v6 = vsel %vm700_vm14, %v806_v37, %v787_v36 }
 0x267   : > { %v752_v53 = vrot.slane %v743_v47, 4  ;;  %v823_v54 = vsel %vm700_vm14, %v754_v35, %v743_v47  ;;  %v828_v55 = vrot.slane %v755_v51, 4  ;;  %v748_v57 = vrot.slane %v731_v46, 4 }
 0x268   : > { %v751_v58 = vsel %vm700_vm14, 0.0, %v750_v49  ;;  %v812_v59 = vsel %vm700_vm14, %v750_v49, %v731_v46  ;;  %v827_v60 = vperm.slane %v823_v54, %v3275_v44  ;;  %v805_v61 = vsel %vm700_vm14, 0.0, %v804_v52 }
 0x269   : > { %v753_v62 = vsel %vm700_vm14, 0.0, %v752_v53  ;;  %v749_v0 = vsel %vm700_vm14, 0.0, %v748_v57  ;;  %v816_v2 = vperm.slane %v812_v59, %v3275_v44  ;;  %v817_v3 = vrot.slane %v751_v58, 4 }
 0x26a   : > { %v829_v4 = vsel %vm700_vm14, %v828_v55, %v753_v62  ;;  %v848_v5 = vrot.slane %v827_v60, 4  ;;  %v871_v7 = vrot.slane %v807_v43, 4  ;;  %v870_v12 = vperm.slane %v866_v6, %v3275_v44 }
 0x26b   : > { %2701 = vrot.lane.b32.xlu0 %v3293_v63, %s2970_s18  ;;  %v818_v8 = vsel %vm700_vm14, %v817_v3, %v749_v0  ;;  %v833_v9 = vperm.slane %v829_v4, %v3275_v44  ;;  %v836_v11 = vrot.slane %v816_v2, 4  ;;  %v881_v16 = vperm.slane %v877_v40, %v3275_v44  ;;  %v921_v0 = vpop.permute.xlu1 %920 }
 0x26c   : > { %v822_v14 = vperm.slane %v818_v8, %v3275_v44  ;;  %v872_v15 = vsel %vm700_vm14, %v871_v7, %v805_v61  ;;  %v883_v17 = vsel %vm700_vm14, %v882_v45, %v809_v48  ;;  %v890_v25 = vrot.slane %v870_v12, 4  ;;  %v923_v61 = vpop.permute.xlu2 %922 }
 0x26d   : > { %v849_v19 = vsel %vm700_vm14, %v833_v9, %v848_v5  ;;  %v846_v20 = vrot.slane %v833_v9, 4  ;;  %v876_v63 = vperm.slane %v872_v15, %v3275_v44  ;;  %v887_v21 = vperm.slane %v883_v17, %v3275_v44 }
 0x26e   : > { %v837_v23 = vsel %vm700_vm14, %v822_v14, %v836_v11  ;;  %v857_v24 = vperm.slane %v849_v19, %v3295_v1  ;;  %v834_v13 = vrot.slane %v822_v14, 4  ;;  %v902_v29 = vrot.slane %v881_v16, 4 }
 0x26f   : > { %v845_v26 = vperm.slane %v837_v23, %v3295_v1  ;;  %v847_v27 = vsel %vm700_vm14, %v846_v20, %v827_v60  ;;  %v888_v30 = vrot.slane %v876_v63, 4  ;;  %v891_v33 = vsel %vm700_vm14, %v876_v63, %v890_v25 }
 0x270   : > { %v862_v31 = vrot.slane %v857_v24, 4  ;;  %v835_v32 = vsel %vm700_vm14, %v834_v13, %v816_v2  ;;  %v853_v18 = vperm.slane %v847_v27, %v3295_v1  ;;  %v899_v36 = vperm.slane %v891_v33, %v3295_v1 }
 0x271   : > { %v864_v34 = vrot.slane %v845_v26, 4  ;;  %v841_v35 = vperm.slane %v835_v32, %v3295_v1  ;;  %v903_v37 = vsel %vm700_vm14, %v887_v21, %v902_v29  ;;  %v889_v41 = vsel %vm700_vm14, %v888_v30, %v870_v12 }
 0x272   : > { %v3365_v38 = vsel %vm700_vm14, %v862_v31, %v845_v26  ;;  %v858_v39 = vrot.slane %v853_v18, 4  ;;  %v911_v40 = vperm.slane %v903_v37, %v3295_v1  ;;  %v895_v42 = vperm.slane %v889_v41, %v3295_v1 }
 0x273   : > { %v900_v43 = vrot.slane %v887_v21, 4  ;;  %v860_v45 = vrot.slane %v841_v35, 4  ;;  %v3371_v46 = vsel %vm700_vm14, %v857_v24, %v864_v34  ;;  %v918_v49 = vrot.slane %v899_v36, 4 }
 0x274   : > { %v3374_v47 = vsel %vm700_vm14, %v858_v39, %v841_v35  ;;  %v916_v48 = vrot.slane %v911_v40, 4  ;;  %v914_v53 = vrot.slane %v895_v42, 4  ;;  %v1002_v4 = vrot.slane %v923_v61, 4 }
 0x275   : > { %v901_v51 = vsel %vm700_vm14, %v900_v43, %v881_v16  ;;  %v3378_v52 = vsel %vm700_vm14, %v853_v18, %v860_v45  ;;  %v3385_v57 = vsel %vm700_vm14, %v911_v40, %v918_v49  ;;  %v946_v15 = vrot.slane %v921_v0, 4 }
 0x276   : > { %v3381_v54 = vsel %vm700_vm14, %v916_v48, %v899_v36  ;;  %v907_v55 = vperm.slane %v901_v51, %v3295_v1  ;;  %v1186_v20 = vrot.slane %v3286_v56, 4  ;;  %v1242_v13 = vrot.slane %v3281_v50, 4 }
 0x278   : > { %v912_v58 = vrot.slane %v907_v55, 4  ;;  %v3388_v59 = vsel %vm700_vm14, %v907_v55, %v914_v53 }
 0x27a   : > { %v3391_v60 = vsel %vm700_vm14, %v912_v58, %v895_v42 }
 0x2a6   : > { %v931_v62 = vpop.permute.xlu2 %930 }
 0x2a7   : > { %v1000_v3 = vrot.slane %v931_v62, 4  ;;  %v1003_v6 = vsel %vm700_vm14, %v931_v62, %v1002_v4 }
 0x2a8   : > { %v1011_v11 = vperm.slane %v1003_v6, %v3275_v44 }
 0x2a9   : > { %v1001_v8 = vsel %vm700_vm14, %v1000_v3, %v923_v61 }
 0x2aa   : > { %v1007_v14 = vperm.slane %v1001_v8, %v3275_v44  ;;  %v1038_v63 = vrot.slane %v1011_v11, 4 }
 0x2ac   : > { %v1026_v25 = vrot.slane %v1007_v14, 4 }
 0x2ae   : > { %v3393_v2 = vpop.permute.xlu2 %924 }
 0x2af   : > { %v958_v26 = vrot.slane %v3393_v2, 4 }
 0x2b6   : > { %v927_v5 = vpop.permute.xlu0 %926  ;;  %v3397_v9 = vpop.permute.xlu2 %2691 }
 0x2b7   : > { %v2694_v16 = vunpack.i.h.bf16 %v3397_v9  ;;  %v1014_v17 = vrot.slane %v927_v5, 4  ;;  %v2693_v19 = vunpack.i.l.bf16 %v3397_v9 }
 0x2b9   : > { %v3411_v31 = vrot.slane %v2694_v16, 4  ;;  %v3416_v34 = vrot.slane %v2693_v19, 4 }
 0x2c6   : > { %v929_v7 = vpop.permute.xlu1 %928 }
 0x2c7   : > { %v944_v12 = vrot.slane %v929_v7, 4  ;;  %v947_v23 = vsel %vm700_vm14, %v929_v7, %v946_v15 }
 0x2c8   : > { %v955_v36 = vperm.slane %v947_v23, %v3275_v44 }
 0x2c9   : > { %v945_v21 = vsel %vm700_vm14, %v944_v12, %v921_v0 }
 0x2ca   : > { %v3419_v35 = vperm.slane %v945_v21, %v3275_v44  ;;  %v982_v4 = vrot.slane %v955_v36, 4 }
 0x2cd   : > { %v935_v24 = vpop.permute.xlu0 %934 }
 0x2ce   : > { %v1012_v27 = vrot.slane %v935_v24, 4  ;;  %v1015_v29 = vsel %vm700_vm14, %v935_v24, %v1014_v17  ;;  %v2697_v30 = vpop.permute.xlu1 %2696  ;;  %v970_v17 = vrot.slane %v3419_v35, 4 }
 0x2cf   : > { %v1023_v32 = vperm.slane %v1015_v29, %v3275_v44  ;;  %v2699_v18 = vunpack.i.h.bf16 %v2697_v30  ;;  %v2698_v33 = vunpack.i.l.bf16 %v2697_v30 }
 0x2d0   : > { %v1013_v37 = vsel %vm700_vm14, %v1012_v27, %v927_v5 }
 0x2d1   : > { %v1019_v39 = vperm.slane %v1013_v37, %v3275_v44  ;;  %v1036_v40 = vrot.slane %v1023_v32, 4  ;;  %v1039_v41 = vsel %vm700_vm14, %v1023_v32, %v1038_v63  ;;  %v1184_v42 = vrot.slane %v2699_v18, 4 }
 0x2d2   : > { %v1047_v43 = vperm.slane %v1039_v41, %v3295_v1  ;;  %v1187_v45 = vsel %vm700_vm14, %v2699_v18, %v1186_v20  ;;  %v1240_v48 = vrot.slane %v2698_v33, 4  ;;  %v1243_v49 = vsel %vm700_vm14, %v2698_v33, %v1242_v13 }
 0x2d3   : > { %v1024_v51 = vrot.slane %v1019_v39, 4  ;;  %v1027_v53 = vsel %vm700_vm14, %v1019_v39, %v1026_v25  ;;  %v1037_v55 = vsel %vm700_vm14, %v1036_v40, %v1011_v11  ;;  %v1185_v58 = vsel %vm700_vm14, %v1184_v42, %v3286_v56 }
 0x2d4   : > { %v1035_v61 = vperm.slane %v1027_v53, %v3295_v1  ;;  %v1043_v62 = vperm.slane %v1037_v55, %v3295_v1  ;;  %v1054_v0 = vrot.slane %v1047_v43, 4  ;;  %v3435_v3 = vperm.slane %v1185_v58, %v3275_v44 }
 0x2d5   : > { %v1025_v5 = vsel %vm700_vm14, %v1024_v51, %v1007_v14  ;;  %v3439_v6 = vperm.slane %v1187_v45, %v3275_v44  ;;  %v1241_v7 = vsel %vm700_vm14, %v1240_v48, %v3281_v50  ;;  %v933_v8 = vpop.permute.xlu0 %932  ;;  %v3448_v14 = vperm.slane %v1243_v49, %v3275_v44 }
 0x2d6   : > { %v1031_v56 = vperm.slane %v1025_v5, %v3295_v1  ;;  %v1050_v11 = vrot.slane %v1035_v61, 4  ;;  %v1052_v12 = vrot.slane %v1043_v62, 4  ;;  %v1055_v15 = vsel %vm700_vm14, 0.0, %v1054_v0 }
 0x2d7   : > { %v1121_v20 = vsel %vm700_vm14, %v1054_v0, %v1043_v62  ;;  %v1126_v63 = vrot.slane %v1055_v15, 4  ;;  %v1210_v50 = vrot.slane %v3435_v3, 4  ;;  %v3454_v24 = vperm.slane %v1241_v7, %v3275_v44 }
 0x2d8   : > { %v1051_v21 = vsel %vm700_vm14, 0.0, %v1050_v11  ;;  %v1053_v23 = vsel %vm700_vm14, 0.0, %v1052_v12  ;;  %v3457_v25 = vperm.slane %v1121_v20, %v3275_v44  ;;  %v956_v27 = vrot.slane %v933_v8, 4 }
 0x2d9   : > { %v1115_v13 = vrot.slane %v1051_v21, 4  ;;  %v959_v29 = vsel %vm700_vm14, %v933_v8, %v958_v26  ;;  %v1222_v30 = vrot.slane %v3439_v6, 4  ;;  %v1048_v18 = vrot.slane %v1031_v56, 4 }
 0x2da   : > { %v967_v32 = vperm.slane %v959_v29, %v3275_v44  ;;  %v1110_v33 = vsel %vm700_vm14, %v1050_v11, %v1031_v56  ;;  %v1266_v37 = vrot.slane %v3454_v24, 4  ;;  %v1278_v39 = vrot.slane %v3448_v14, 4 }
 0x2db   : > { %v957_v40 = vsel %vm700_vm14, %v956_v27, %v3393_v2  ;;  %v1127_v41 = vsel %vm700_vm14, %v1126_v63, %v1053_v23  ;;  %v1049_v45 = vsel %vm700_vm14, 0.0, %v1048_v18  ;;  %v3473_v51 = vperm.slane %v1110_v33, %v3275_v44 }
 0x2dc   : > { %v963_v42 = vperm.slane %v957_v40, %v3275_v44  ;;  %v980_v43 = vrot.slane %v967_v32, 4  ;;  %v983_v26 = vsel %vm700_vm14, %v967_v32, %v982_v4  ;;  %v1116_v53 = vsel %vm700_vm14, %v1115_v13, %v1049_v45 }
 0x2dd   : > { %v991_v48 = vperm.slane %v983_v26, %v3295_v1  ;;  %v2702_v49 = vpop.permute.xlu0 %2701  ;;  %v1146_v55 = vrot.slane %v3457_v25, 4  ;;  %v3482_v7 = vperm.slane %v1127_v41, %v3275_v44  ;;  %v1134_v23 = vrot.slane %v3473_v51, 4 }
 0x2de   : > { %v968_v2 = vrot.slane %v963_v42, 4  ;;  %v971_v58 = vsel %vm700_vm14, %v963_v42, %v970_v17  ;;  %v981_v61 = vsel %vm700_vm14, %v980_v43, %v955_v36  ;;  %v2704_v62 = vunpack.i.h.bf16 %v2702_v49 }
 0x2df   : > { %v979_v0 = vperm.slane %v971_v58, %v3295_v1  ;;  %v987_v4 = vperm.slane %v981_v61, %v3295_v1  ;;  %v998_v5 = vrot.slane %v991_v48, 4  ;;  %v2703_v11 = vunpack.i.l.bf16 %v2702_v49 }
 0x2e0   : > { %v969_v8 = vsel %vm700_vm14, %v968_v2, %v3419_v35  ;;  %v1196_v56 = vrot.slane %v2704_v62, 4  ;;  %v1199_v12 = vsel %vm700_vm14, %v2704_v62, %v3411_v31  ;;  %v1120_v29 = vperm.slane %v1116_v53, %v3275_v44 }
 0x2e1   : > { %v975_v15 = vperm.slane %v969_v8, %v3295_v1  ;;  %v994_v36 = vrot.slane %v979_v0, 4  ;;  %v996_v17 = vrot.slane %v987_v4, 4  ;;  %v3490_v20 = vsel %vm700_vm14, 0.0, %v998_v5 }
 0x2e2   : > { %v1067_v63 = vsel %vm700_vm14, %v998_v5, %v987_v4  ;;  %v1197_v21 = vsel %vm700_vm14, %v1196_v56, %v2694_v16  ;;  %v1207_v35 = vperm.slane %v1199_v12, %v3275_v44  ;;  %v1072_v27 = vrot.slane %v3490_v20, 4 }
 0x2e3   : > { %v992_v13 = vrot.slane %v975_v15, 4  ;;  %v995_v31 = vsel %vm700_vm14, 0.0, %v994_v36  ;;  %v997_v32 = vsel %vm700_vm14, 0.0, %v996_v17  ;;  %v1203_v18 = vperm.slane %v1197_v21, %v3275_v44 }
 0x2e4   : > { %v1220_v33 = vrot.slane %v1207_v35, 4  ;;  %v1223_v40 = vsel %vm700_vm14, %v1207_v35, %v1222_v30  ;;  %v3505_v16 = vperm.slane %v1067_v63, %v3275_v44  ;;  %v1252_v42 = vrot.slane %v2703_v11, 4 }
 0x2e5   : > { %v1231_v41 = vperm.slane %v1223_v40, %v3295_v1  ;;  %v1255_v43 = vsel %vm700_vm14, %v2703_v11, %v3416_v34  ;;  %v1208_v26 = vrot.slane %v1203_v18, 4  ;;  %v1211_v45 = vsel %vm700_vm14, %v1203_v18, %v1210_v50 }
 0x2e6   : > { %v1221_v48 = vsel %vm700_vm14, %v1220_v33, %v3439_v6  ;;  %v1263_v49 = vperm.slane %v1255_v43, %v3275_v44  ;;  %v1219_v53 = vperm.slane %v1211_v45, %v3295_v1  ;;  %v1253_v58 = vsel %vm700_vm14, %v1252_v42, %v2693_v19 }
 0x2e7   : > { %v3516_v30 = vperm.slane %v1221_v48, %v3295_v1  ;;  %v3518_v2 = vrot.slane %v1231_v41, 4  ;;  %v1209_v34 = vsel %vm700_vm14, %v1208_v26, %v3435_v3  ;;  %v1259_v50 = vperm.slane %v1253_v58, %v3275_v44 }
 0x2e8   : > { %v1276_v61 = vrot.slane %v1263_v49, 4  ;;  %v1279_v6 = vsel %vm700_vm14, %v1263_v49, %v1278_v39  ;;  %v1061_v62 = vrot.slane %v995_v31, 4  ;;  %v3528_v0 = vperm.slane %v1209_v34, %v3295_v1 }
 0x2e9   : > { %v3532_v4 = vsel %vm700_vm14, 0.0, %v3518_v2  ;;  %v1135_v9 = vsel %vm700_vm14, %v1120_v29, %v1134_v23  ;;  %v1264_v5 = vrot.slane %v1259_v50, 4  ;;  %v1267_v19 = vsel %vm700_vm14, %v1259_v50, %v1266_v37 }
 0x2ea   : > { %v1277_v3 = vsel %vm700_vm14, %v1276_v61, %v3448_v14  ;;  %v1287_v39 = vperm.slane %v1279_v6, %v3295_v1  ;;  %v3541_v8 = vrot.slane %v1219_v53, 4  ;;  %v1236_v56 = vrot.slane %v3516_v30, 4 }
 0x2eb   : > { %v1275_v11 = vperm.slane %v1267_v19, %v3295_v1  ;;  %v1283_v12 = vperm.slane %v1277_v3, %v3295_v1  ;;  %v1265_v17 = vsel %vm700_vm14, %v1264_v5, %v3454_v24  ;;  %v1312_v63 = vrot.slane %v3532_v4, 4 }
 0x2ec   : > { %v1294_v20 = vrot.slane %v1287_v39, 4  ;;  %v1147_v37 = vsel %vm700_vm14, %v3482_v7, %v1146_v55  ;;  %v1271_v14 = vperm.slane %v1265_v17, %v3295_v1  ;;  %v1143_v21 = vperm.slane %v1135_v9, %v3295_v1 }
 0x2ed   : > { %v1155_v35 = vperm.slane %v1147_v37, %v3295_v1  ;;  %v1290_v23 = vrot.slane %v1275_v11, 4  ;;  %v1292_v31 = vrot.slane %v1283_v12, 4  ;;  %v1132_v18 = vrot.slane %v1120_v29, 4 }
 0x2ee   : > { %v1144_v33 = vrot.slane %v3482_v7, 4  ;;  %v1295_v24 = vsel %vm700_vm14, 0.0, %v1294_v20  ;;  %v993_v41 = vsel %vm700_vm14, 0.0, %v992_v13  ;;  %v1056_v42 = vsel %vm700_vm14, %v994_v36, %v975_v15 }
 0x2ef   : > { %v1160_v40 = vrot.slane %v1155_v35, 4  ;;  %v1133_v55 = vsel %vm700_vm14, %v1132_v18, %v3473_v51  ;;  %v1060_v26 = vperm.slane %v1056_v42, %v3275_v44  ;;  %v1062_v45 = vsel %vm700_vm14, %v1061_v62, %v993_v41 }
 0x2f0   : > { %v1145_v43 = vsel %vm700_vm14, %v1144_v33, %v3457_v25  ;;  %v1139_v7 = vperm.slane %v1133_v55, %v3295_v1  ;;  %v1066_v13 = vperm.slane %v1062_v45, %v3275_v44  ;;  %v1162_v49 = vrot.slane %v1143_v21, 4 }
 0x2f1   : > { %v1161_v29 = vsel %vm700_vm14, %v1160_v40, %v1143_v21  ;;  %v1151_v48 = vperm.slane %v1145_v43, %v3295_v1  ;;  %v1073_v51 = vsel %vm700_vm14, %v1072_v27, %v997_v32  ;;  %v1080_v15 = vrot.slane %v1060_v26, 4 }
 0x2f2   : > { %2570 = vmatpush.xpose.msk.msra.mxu2 %vm1404_vm15, %v1161_v29  ;;  %v1092_v25 = vrot.slane %v3505_v16, 4  ;;  %v1366_v36 = vrot.slane %v1295_v24, 4  ;;  %v1077_v58 = vperm.slane %v1073_v51, %v3275_v44  ;;  %v1078_v34 = vrot.slane %v1066_v13, 4 }
 0x2f3   : > { %v1156_v53 = vrot.slane %v1151_v48, 4  ;;  %v1081_v50 = vsel %vm700_vm14, %v1066_v13, %v1080_v15  ;;  %v1158_v61 = vrot.slane %v1139_v7, 4  ;;  %v1288_v6 = vrot.slane %v1271_v14, 4 }
 0x2f4   : > { %v1291_v62 = vsel %vm700_vm14, 0.0, %v1290_v23  ;;  %v1093_v5 = vsel %vm700_vm14, %v1077_v58, %v1092_v25  ;;  %v1079_v27 = vsel %vm700_vm14, %v1078_v34, %v1060_v26  ;;  %v1293_v32 = vsel %vm700_vm14, 0.0, %v1292_v31 }
 0x2f5   : > { %v1157_v9 = vsel %vm700_vm14, %v1156_v53, %v1139_v7  ;;  %v3580_v19 = vperm.slane %v1081_v50, %v3295_v1  ;;  %v3583_v3 = vperm.slane %v1093_v5, %v3295_v1  ;;  %v1085_v39 = vperm.slane %v1079_v27, %v3295_v1 }
 0x2f6   : > { %2562 = vmatpush.xpose.msk.msra.mxu3 %vm1404_vm15, %v1157_v9  ;;  %v1090_v11 = vrot.slane %v1077_v58, 4  ;;  %v1289_v17 = vsel %vm700_vm14, 0.0, %v1288_v6  ;;  %v1350_v37 = vsel %vm700_vm14, %v1290_v23, %v1271_v14  ;;  %v1355_v21 = vrot.slane %v1291_v62, 4 }
 0x2f7   : > { %v1361_v18 = vsel %vm700_vm14, %v1294_v20, %v1283_v12  ;;  %v1106_v31 = vrot.slane %v3583_v3, 4  ;;  %v1104_v24 = vrot.slane %v1085_v39, 4  ;;  %v1354_v40 = vperm.slane %v1350_v37, %v3275_v44 }
 0x2f8   : > { %v1091_v33 = vsel %vm700_vm14, %v1090_v11, %v3505_v16  ;;  %v1356_v42 = vsel %vm700_vm14, %v1355_v21, %v1289_v17  ;;  %v1365_v55 = vperm.slane %v1361_v18, %v3275_v44  ;;  %v1367_v43 = vsel %vm700_vm14, %v1366_v36, %v1293_v32 }
 0x2f9   : > { %v1097_v41 = vperm.slane %v1091_v33, %v3295_v1  ;;  %v1107_v14 = vsel %vm700_vm14, %v1106_v31, %v3580_v19  ;;  %v1360_v12 = vperm.slane %v1356_v42, %v3275_v44  ;;  %v1371_v20 = vperm.slane %v1367_v43, %v3275_v44 }
 0x2fa   : > { %v1374_v23 = vrot.slane %v1354_v40, 4  ;;  %2571 = vmatpush.xpose.msk.msra.mxu2 %vm1404_vm15, %v1107_v14  ;;  %v1159_v26 = vsel %vm700_vm14, %v1151_v48, %v1158_v61  ;;  %v1163_v45 = vsel %vm700_vm14, %v1155_v35, %v1162_v49  ;;  %v1386_v29 = vrot.slane %v1365_v55, 4 }
 0x2fb   : > { %v1102_v16 = vrot.slane %v1097_v41, 4  ;;  %v1372_v13 = vrot.slane %v1360_v12, 4  ;;  %v1384_v51 = vrot.slane %v1371_v20, 4  ;;  %v1232_v15 = vrot.slane %v3528_v0, 4 }
 0x2fc   : > { %v1375_v7 = vsel %vm700_vm14, %v1360_v12, %v1374_v23  ;;  %v1105_v36 = vsel %vm700_vm14, %v1097_v41, %v1104_v24  ;;  %v1387_v58 = vsel %vm700_vm14, %v1371_v20, %v1386_v29  ;;  %v1108_v48 = vrot.slane %v3580_v19, 4 }
 0x2fd   : > { %v1103_v25 = vsel %vm700_vm14, %v1102_v16, %v1085_v39  ;;  %v3609_v53 = vperm.slane %v1375_v7, %v3295_v1  ;;  %2572 = vmatmul.msk.f32.vlgmr.msra.gmra.mxu2 %vm1404_vm15, %v3365_v38  ;;  %v1395_v35 = vperm.slane %v1387_v58, %v3295_v1  ;;  %v1373_v49 = vsel %vm700_vm14, %v1372_v13, %v1354_v40 }
 0x2fe   : > { %2563 = vmatpush.xpose.msk.msra.mxu3 %vm1404_vm15, %v1103_v25  ;;  %v1385_v34 = vsel %vm700_vm14, %v1384_v51, %v1365_v55  ;;  %v1379_v50 = vperm.slane %v1373_v49, %v3295_v1  ;;  %v1233_v6 = vsel %vm700_vm14, 0.0, %v1232_v15  ;;  %v1235_v62 = vsel %vm700_vm14, 0.0, %v3541_v8 }
 0x2ff   : > { %v1391_v61 = vperm.slane %v1385_v34, %v3295_v1  ;;  %v1400_v38 = vrot.slane %v1395_v35, 4  ;;  %v1237_v9 = vsel %vm700_vm14, 0.0, %v1236_v56  ;;  %v1296_v5 = vsel %vm700_vm14, %v3541_v8, %v3528_v0 }
 0x300   : > { %v1301_v27 = vrot.slane %v1235_v62, 4  ;;  %v1300_v19 = vperm.slane %v1296_v5, %v3275_v44  ;;  %v1307_v39 = vsel %vm700_vm14, %v3518_v2, %v3516_v30  ;;  %v1313_v11 = vsel %vm700_vm14, %v1312_v63, %v1237_v9 }
 0x301   : > { %2564 = vmatmul.msk.f32.vlgmr.msra.gmra.mxu3 %vm1404_vm15, %v3374_v47  ;;  %v1396_v32 = vrot.slane %v1391_v61, 4  ;;  %v1401_v56 = vsel %vm700_vm14, %v1400_v38, %v3609_v53  ;;  %v1311_v8 = vperm.slane %v1307_v39, %v3275_v44  ;;  %v1317_v47 = vperm.slane %v1313_v11, %v3275_v44 }
 0x302   : > { %2566 = vmatpush.xpose.msk.msrb.mxu3 %vm1404_vm15, %v1159_v26  ;;  %v1302_v0 = vsel %vm700_vm14, %v1301_v27, %v1233_v6  ;;  %1708 = vmatpush.msrb.mxu2 %v1401_v56  ;;  %v1320_v2 = vrot.slane %v1300_v19, 4  ;;  %v1398_v4 = vrot.slane %v1379_v50, 4  ;;  %v1109_v33 = vsel %vm700_vm14, %v3583_v3, %v1108_v48 }
 0x303   : > { %v1397_v17 = vsel %vm700_vm14, %v1396_v32, %v1379_v50  ;;  %v1306_v30 = vperm.slane %v1302_v0, %v3275_v44  ;;  %v1332_v63 = vrot.slane %v1311_v8, 4  ;;  %v1330_v37 = vrot.slane %v1317_v47, 4 }
 0x304   : > { %1650 = vmatpush.msrb.mxu0 %v1397_v17  ;;  %v1399_v31 = vsel %vm700_vm14, %v1391_v61, %v1398_v4  ;;  %v1402_v26 = vrot.slane %v3609_v53, 4  ;;  %v1545_v7 = vlaneseq }
 0x305   : > { %v1321_v21 = vsel %vm700_vm14, %v1306_v30, %v1320_v2  ;;  %v1318_v18 = vrot.slane %v1306_v30, 4  ;;  %2573 = vmatmul.msk.f32.gmra.mxu2 %vm1404_vm15, %v3381_v54  ;;  %v1333_v24 = vsel %vm700_vm14, %v1317_v47, %v1332_v63  ;;  %v1331_v40 = vsel %vm700_vm14, %v1330_v37, %v1311_v8  ;;  %1679 = vmatpush.msrb.mxu1 %v1399_v31 }
 0x306   : > { %2567 = vmatpush.xpose.msk.msrb.mxu3 %vm1404_vm15, %v1105_v36  ;;  %v1329_v41 = vperm.slane %v1321_v21, %v3295_v1  ;;  %v1341_v42 = vperm.slane %v1333_v24, %v3295_v1  ;;  %v1337_v43 = vperm.slane %v1331_v40, %v3295_v1  ;;  %v1403_v29 = vsel %vm700_vm14, %v1395_v35, %v1402_v26 }
 0x307   : > { %v1319_v55 = vsel %vm700_vm14, %v1318_v18, %v1300_v19  ;;  %v1546_v13 = vand.u32 127, %v1545_v7 }
 0x308   : > { %v1325_v54 = vperm.slane %v1319_v55, %v3295_v1  ;;  %v1346_v14 = vrot.slane %v1341_v42, 4  ;;  %v1342_v3 = vrot.slane %v1337_v43, 4 }
 0x309   : > { %2565 = vmatmul.msk.f32.gmra.mxu3 %vm1404_vm15, %v3391_v60  ;;  %vm1547_vm1 = vcmp.lt.s32.totalorder %v1546_v13, 10 }
 0x30a   : > { %2574 = vmatpush.xpose.msk.msra.mxu3 %vm1404_vm15, %v1163_v45  ;;  %v1344_v12 = vrot.slane %v1325_v54, 4  ;;  %v1347_v20 = vsel %vm700_vm14, %v1346_v14, %v1329_v41  ;;  %v1343_v23 = vsel %vm700_vm14, %v1342_v3, %v1325_v54  ;;  %v1348_v45 = vrot.slane %v1329_v41, 4 }
 0x30b   : > { %1709 = vmatpush.msrb.mxu2 %v1347_v20  ;;  %1651 = vmatpush.msrb.mxu0 %v1343_v23 }
 0x30c   : > { %v1345_v16 = vsel %vm700_vm14, %v1337_v43, %v1344_v12  ;;  %v1349_v60 = vsel %vm700_vm14, %v1341_v42, %v1348_v45 }
 0x30d   : > { %1680 = vmatpush.msrb.mxu1 %v1345_v16 }
 0x30e   : > { %2575 = vmatpush.xpose.msk.msra.mxu3 %vm1404_vm15, %v1109_v33 }
 0x311   : > { %2568 = vmatmul.msk.f32.vlgmr.msrb.gmra.mxu3 %vm1404_vm15, %v3378_v52 }
 0x312   : > { %1737 = vmatpush.msrb.mxu3 %v1403_v29 }
 0x314   : > { %1738 = vmatpush.msrb.mxu3 %v1349_v60 }
 0x319   : > { %2569 = vmatmul.msk.f32.gmra.mxu3 %vm1404_vm15, %v3388_v59 }
 0x321   : > { %2576 = vmatmul.msk.f32.vlgmr.msra.gmra.mxu3 %vm1404_vm15, %v3371_v46 }
 0x329   : > { %2577 = vmatmul.msk.f32.gmra.mxu3 %vm1404_vm15, %v3385_v57 }
 0x380   : > { %v1504_v51 = vpop.f32.mrf.mxu2 }
 0x381   : > { %v1554_v52 = vsel %vm1547_vm1, %v1504_v51, -1e+30 }
 0x382   : > { %v1570_v15 = vsel %vm1404_vm15, %v1554_v52, -inf }
 0x383   : > { %1571 = vmax.xlane.f32.xlu2 %v1570_v15 }
 0x384   : > { %v1434_v25 = vpop.f32.mrf.mxu3 }
 0x385   : > { %v1550_v36 = vsel %vm1547_vm1, %v1434_v25, -1e+30 }
 0x386   : > { %v1558_v59 = vsel %vm1404_vm15, %v1550_v36, -inf }
 0x387   : > { %1559 = vmax.xlane.f32.xlu0 %v1558_v59 }
 0x388   : > { %v1507_v53 = vpop.f32.mrf.mxu2 }
 0x389   : > { %v1555_v46 = vsel %vm1547_vm1, %v1507_v53, -1e+30 }
 0x38a   : > { %v1573_v57 = vsel %vm1404_vm15, %v1555_v46, -inf }
 0x38b   : > { %1574 = vmax.xlane.f32.xlu2 %v1573_v57 }
 0x38c   : > { %v1437_v58 = vpop.f32.mrf.mxu3 }
 0x38d   : > { %v1551_v35 = vsel %vm1547_vm1, %v1437_v58, -1e+30 }
 0x38e   : > { %v1561_v48 = vsel %vm1404_vm15, %v1551_v35, -inf }
 0x393   : > { %1562 = vmax.xlane.f32.xlu2 %v1561_v48 }
 0x394   : > { %v1469_v49 = vpop.f32.mrf.mxu3 }
 0x395   : > { %v1552_v62 = vsel %vm1547_vm1, %v1469_v49, -1e+30 }
 0x396   : > { %v1564_v5 = vsel %vm1404_vm15, %v1552_v62, -inf }
 0x39c   : > { %v1472_v34 = vpop.f32.mrf.mxu3 }
 0x39d   : > { %v1553_v32 = vsel %vm1547_vm1, %v1472_v34, -1e+30 }
 0x39e   : > { %v1567_v19 = vsel %vm1404_vm15, %v1553_v32, -inf }
 0x3a4   : > { %v1539_v50 = vpop.f32.mrf.mxu3 }
 0x3a5   : > { %v1556_v61 = vsel %vm1547_vm1, %v1539_v50, -1e+30 }
 0x3a6   : > { %v1576_v6 = vsel %vm1404_vm15, %v1556_v61, -inf }
 0x3a7   : > { %1577 = vmax.xlane.f32.xlu1 %v1576_v6 }
 0x3ac   : > { %v1542_v38 = vpop.f32.mrf.mxu3 }
 0x3ad   : > { %v1557_v9 = vsel %vm1547_vm1, %v1542_v38, -1e+30 }
 0x3ae   : > { %v1579_v27 = vsel %vm1404_vm15, %v1557_v9, -inf }
 0x3af   : > { %1565 = vmax.xlane.f32.xlu1 %v1564_v5  ;;  %1580 = vmax.xlane.f32.xlu0 %v1579_v27 }
 0x3b7   : > { %1568 = vmax.xlane.f32.xlu1 %v1567_v19 }
 0x3f6   : > { %v1572_v39 = vpop.xlane.xlu2 %1571 }
 0x3f7   : > { %v1586_v11 = vsub.f32 %v1554_v52, %v1572_v39 }
 0x3f9   : > { %v1598_v56 = vmul.f32 1.442695, %v1586_v11 }
 0x3fa   : > { %v1560_v0 = vpop.xlane.xlu0 %1559 }
 0x3fb   : > { %v1582_v8 = vsub.f32 %v1550_v36, %v1560_v0  ;;  %2722 = vpow2.f32 %v1598_v56 }
 0x3fd   : > { %v1590_v47 = vmul.f32 1.442695, %v1582_v8 }
 0x3fe   : > { %v1575_v17 = vpop.xlane.xlu2 %1574 }
 0x3ff   : > { %2724 = vpow2.f32 %v1590_v47  ;;  %v1587_v30 = vsub.f32 %v1555_v46, %v1575_v17 }
 0x401   : > { %v2723_v2 = vpop.eup %2722  ;;  %v1600_v4 = vmul.f32 1.442695, %v1587_v30 }
 0x402   : > { %2582 = vmatmul.msk.f32.vlgmr.msrb.gmra.mxu2 %vm1404_vm15, %v2723_v2  ;;  %v1618_v63 = vsel %vm1404_vm15, %v2723_v2, 0.0 }
 0x403   : > { %2726 = vpow2.f32 %v1600_v4  ;;  %1619 = vadd.xlane.f32.xlu0 %v1618_v63 }
 0x405   : > { %v2725_v37 = vpop.eup %2724 }
 0x406   : > { %2578 = vmatmul.msk.f32.vlgmr.msrb.gmra.mxu0 %vm1404_vm15, %v2725_v37  ;;  %v1606_v21 = vsel %vm1404_vm15, %v2725_v37, 0.0  ;;  %v1563_v18 = vpop.xlane.xlu2 %1562 }
 0x407   : > { %1607 = vadd.xlane.f32.xlu2 %v1606_v21  ;;  %v1583_v31 = vsub.f32 %v1551_v35, %v1563_v18 }
 0x409   : > { %v2727_v33 = vpop.eup %2726  ;;  %v1592_v24 = vmul.f32 1.442695, %v1583_v31 }
 0x40a   : > { %2583 = vmatmul.msk.f32.gmra.mxu2 %vm1404_vm15, %v2727_v33  ;;  %v1621_v40 = vsel %vm1404_vm15, %v2727_v33, 0.0 }
 0x40b   : > { %2728 = vpow2.f32 %v1592_v24 }
 0x40f   : > { %1622 = vadd.xlane.f32.xlu2 %v1621_v40 }
 0x411   : > { %v2729_v41 = vpop.eup %2728 }
 0x412   : > { %2579 = vmatmul.msk.f32.gmra.mxu0 %vm1404_vm15, %v2729_v41  ;;  %v1609_v51 = vsel %vm1404_vm15, %v2729_v41, 0.0 }
 0x41a   : > { %v1578_v42 = vpop.xlane.xlu1 %1577 }
 0x41b   : > { %v1588_v55 = vsub.f32 %v1556_v61, %v1578_v42 }
 0x41d   : > { %v1602_v43 = vmul.f32 1.442695, %v1588_v55 }
 0x41f   : > { %2730 = vpow2.f32 %v1602_v43 }
 0x422   : > { %v1581_v54 = vpop.xlane.xlu0 %1580  ;;  %v1566_v14 = vpop.xlane.xlu1 %1565 }
 0x423   : > { %v1589_v3 = vsub.f32 %v1557_v9, %v1581_v54  ;;  %v1584_v12 = vsub.f32 %v1552_v62, %v1566_v14 }
 0x425   : > { %v2731_v20 = vpop.eup %2730  ;;  %v1604_v23 = vmul.f32 1.442695, %v1589_v3  ;;  %v1594_v16 = vmul.f32 1.442695, %v1584_v12 }
 0x426   : > { %2584 = vmatmul.msk.f32.vlgmr.msrb.gmra.mxu3 %vm1404_vm15, %v2731_v20  ;;  %v1624_v26 = vsel %vm1404_vm15, %v2731_v20, 0.0 }
 0x427   : > { %2732 = vpow2.f32 %v1604_v23  ;;  %1625 = vadd.xlane.f32.xlu1 %v1624_v26 }
 0x428   : > { %2734 = vpow2.f32 %v1594_v16 }
 0x42a   : > { %v1569_v45 = vpop.xlane.xlu1 %1568 }
 0x42b   : > { %v1585_v29 = vsub.f32 %v1553_v32, %v1569_v45 }
 0x42d   : > { %v2733_v60 = vpop.eup %2732  ;;  %v1596_v7 = vmul.f32 1.442695, %v1585_v29 }
 0x42e   : > { %v2735_v13 = vpop.eup %2734  ;;  %2585 = vmatmul.msk.f32.gmra.mxu3 %vm1404_vm15, %v2733_v60  ;;  %v1627_v36 = vsel %vm1404_vm15, %v2733_v60, 0.0 }
 0x42f   : > { %2736 = vpow2.f32 %v1596_v7  ;;  %2580 = vmatmul.msk.f32.vlgmr.msrb.gmra.mxu1 %vm1404_vm15, %v2735_v13  ;;  %1610 = vadd.xlane.f32.xlu1 %v1609_v51  ;;  %v1612_v52 = vsel %vm1404_vm15, %v2735_v13, 0.0 }
 0x430   : > { %1613 = vadd.xlane.f32.xlu0 %v1612_v52 }
 0x435   : > { %v2737_v15 = vpop.eup %2736 }
 0x436   : > { %v1615_v25 = vsel %vm1404_vm15, %v2737_v15, 0.0 }
 0x437   : > { %2581 = vmatmul.msk.f32.gmra.mxu1 %vm1404_vm15, %v2737_v15  ;;  %1616 = vadd.xlane.f32.xlu2 %v1615_v25 }
 0x438   : > { %1628 = vadd.xlane.f32.xlu0 %v1627_v36 }
 0x476   : > { %v1620_v59 = vpop.xlane.xlu0 %1619 }
 0x477   : > { %2738 = vrcp.f32 %v1620_v59  ;;  %vm1807_vm4 = vweird.f32 %v1620_v59  ;;  %v1813_v27 = vand.u32 2147483648, %v1620_v59  ;;  %v1811_v19 = vand.u32 2147483647, %v1620_v59 }
 0x479   : > { %v1814_v8 = vor.u32 1.1754944e-38, %v1813_v27  ;;  %vm1812_vm9 = vcmp.eq.f32.partialorder %v1811_v19, 8.507059e+37 }
 0x47a   : > { %v1608_v53 = vpop.xlane.xlu2 %1607 }
 0x47b   : > { %2740 = vrcp.f32 %v1608_v53  ;;  %v1757_v5 = vand.u32 2147483648, %v1608_v53  ;;  %vm1751_vm5 = vweird.f32 %v1608_v53  ;;  %v1755_v32 = vand.u32 2147483647, %v1608_v53 }
 0x47d   : > { %v2739_v46 = vpop.eup %2738  ;;  %v1758_v0 = vor.u32 1.1754944e-38, %v1757_v5  ;;  %vm1756_vm8 = vcmp.eq.f32.partialorder %v1755_v32, 8.507059e+37 }
 0x47e   : > { %v1803_v58 = vmul.f32 %v2739_v46, %v1620_v59  ;;  %vm1808_vm2 = vweird.f32 %v2739_v46 }
 0x47f   : > { %vm1809_vm6 = vmor %vm1807_vm4, %vm1808_vm2 }
 0x480   : > { %v1804_v49 = vsub.f32 1.0, %v1803_v58 }
 0x481   : > { %v2741_v57 = vpop.eup %2740 }
 0x482   : > { %v1747_v35 = vmul.f32 %v2741_v57, %v1608_v53  ;;  %v1623_v48 = vpop.xlane.xlu2 %1622  ;;  %v1805_v61 = vmul.f32 %v2739_v46, %v1804_v49  ;;  %vm1752_vm3 = vweird.f32 %v2741_v57 }
 0x483   : > { %2742 = vrcp.f32 %v1623_v48  ;;  %vm1753_vm7 = vmor %vm1751_vm5, %vm1752_vm3  ;;  %v1653_v4 = vpop.f32.mrf.mxu0  ;;  %v1827_v31 = vand.u32 2147483648, %v1623_v48  ;;  %vm1821_vm11 = vweird.f32 %v1623_v48  ;;  %v1825_v41 = vand.u32 2147483647, %v1623_v48 }
 0x484   : > { %v1748_v34 = vsub.f32 1.0, %v1747_v35  ;;  %v1806_v9 = vadd.f32 %v2739_v46, %v1805_v61 }
 0x485   : > { %v1711_v63 = vpop.f32.mrf.mxu2  ;;  %v1828_v14 = vor.u32 1.1754944e-38, %v1827_v31  ;;  %vm1826_vm13 = vcmp.eq.f32.partialorder %v1825_v41, 8.507059e+37 }
 0x486   : > { %v1749_v50 = vmul.f32 %v2741_v57, %v1748_v34  ;;  %v1810_v56 = vsel %vm1809_vm6, %v2739_v46, %v1806_v9 }
 0x487   : > { %v1815_v17 = vsel %vm1812_vm9, %v1814_v8, %v1810_v56 }
 0x488   : > { %v1750_v38 = vadd.f32 %v2741_v57, %v1749_v50  ;;  %v1862_v21 = vmul.f32 %v1815_v17, %v1711_v63 }
 0x489   : > { %v2743_v6 = vpop.eup %2742 }
 0x48a   : > { %v1817_v62 = vmul.f32 %v2743_v6, %v1623_v48  ;;  %v1754_v11 = vsel %vm1753_vm7, %v2741_v57, %v1750_v38  ;;  %vm1822_vm10 = vweird.f32 %v2743_v6  ;;  %v1866_v40 = vrot.slane %v1862_v21, 4 }
 0x48b   : > { %v1759_v47 = vsel %vm1756_vm8, %v1758_v0, %v1754_v11  ;;  %vm1823_vm12 = vmor %vm1821_vm11, %vm1822_vm10 }
 0x48c   : > { %v1818_v39 = vsub.f32 1.0, %v1817_v62  ;;  %v1858_v37 = vmul.f32 %v1759_v47, %v1653_v4 }
 0x48d   : > { %v1714_v29 = vpop.f32.mrf.mxu2 }
 0x48e   : > { %v1819_v2 = vmul.f32 %v2743_v6, %v1818_v39  ;;  %v1868_v24 = vrot.slane %v1858_v37, 4  ;;  %v1867_v12 = vsel %vm700_vm14, %v1866_v40, %v1858_v37 }
 0x48f   : > { %v3717_v13 = vperm.slane %v1867_v12, %v3275_v44 }
 0x490   : > { %v1820_v18 = vadd.f32 %v2743_v6, %v1819_v2  ;;  %v1869_v20 = vsel %vm700_vm14, %v1862_v21, %v1868_v24  ;;  %v1656_v21 = vpop.f32.mrf.mxu0 }
 0x491   : > { %v3720_v51 = vperm.slane %v1869_v20, %v3275_v44  ;;  %v1892_v61 = vrot.slane %v3717_v13, 4 }
 0x492   : > { %v1824_v43 = vsel %vm1823_vm12, %v2743_v6, %v1820_v18 }
 0x493   : > { %v1829_v16 = vsel %vm1826_vm13, %v1828_v14, %v1824_v43  ;;  %v1904_v6 = vrot.slane %v3720_v51, 4 }
 0x494   : > { %v3722_v52 = vmul.f32 %v1829_v16, %v1714_v29 }
 0x496   : > { %v1922_v62 = vrot.slane %v3722_v52, 4 }
 0x49a   : > { %v1626_v30 = vpop.xlane.xlu1 %1625 }
 0x49b   : > { %2744 = vrcp.f32 %v1626_v30  ;;  %v1839_v23 = vand.u32 2147483647, %v1626_v30  ;;  %v1841_v45 = vand.u32 2147483648, %v1626_v30  ;;  %vm1835_vm2 = vweird.f32 %v1626_v30 }
 0x49d   : > { %vm1840_vm4 = vcmp.eq.f32.partialorder %v1839_v23, 8.507059e+37  ;;  %v1842_v53 = vor.u32 1.1754944e-38, %v1841_v45 }
 0x4a1   : > { %v2745_v33 = vpop.eup %2744 }
 0x4a2   : > { %v1831_v42 = vmul.f32 %v2745_v33, %v1626_v30  ;;  %v1611_v55 = vpop.xlane.xlu1 %1610  ;;  %vm1836_vm1 = vweird.f32 %v2745_v33 }
 0x4a3   : > { %v3711_v54 = vpop.xlane.xlu0 %1613  ;;  %2746 = vrcp.f32 %v1611_v55  ;;  %vm1837_vm3 = vmor %vm1835_vm2, %vm1836_vm1  ;;  %v1769_v36 = vand.u32 2147483647, %v1611_v55  ;;  %v1771_v58 = vand.u32 2147483648, %v1611_v55  ;;  %vm1765_vm5 = vweird.f32 %v1611_v55 }
 0x4a4   : > { %v1832_v3 = vsub.f32 1.0, %v1831_v42  ;;  %2748 = vrcp.f32 %v3711_v54  ;;  %v1783_v48 = vand.u32 2147483647, %v3711_v54  ;;  %v1785_v50 = vand.u32 2147483648, %v3711_v54 }
 0x4a5   : > { %vm1779_vm7 = vweird.f32 %v3711_v54  ;;  %vm3737_vm8 = vcmp.eq.f32.partialorder %v1769_v36, 8.507059e+37  ;;  %v1772_v11 = vor.u32 1.1754944e-38, %v1771_v58 }
 0x4a6   : > { %v1833_v26 = vmul.f32 %v2745_v33, %v1832_v3  ;;  %vm3741_vm10 = vcmp.eq.f32.partialorder %v1783_v48, 8.507059e+37  ;;  %v1786_v0 = vor.u32 1.1754944e-38, %v1785_v50 }
 0x4a8   : > { %v1834_v60 = vadd.f32 %v2745_v33, %v1833_v26 }
 0x4a9   : > { %v2747_v7 = vpop.eup %2746  ;;  %v1740_v5 = vpop.f32.mrf.mxu3 }
 0x4aa   : > { %v2749_v15 = vpop.eup %2748  ;;  %v1761_v25 = vmul.f32 %v2747_v7, %v1611_v55  ;;  %v1838_v59 = vsel %vm1837_vm3, %v2745_v33, %v1834_v60  ;;  %v3724_v46 = vpop.xlane.xlu2 %1616  ;;  %vm1766_vm6 = vweird.f32 %v2747_v7 }
 0x4ab   : > { %v1775_v57 = vmul.f32 %v2749_v15, %v3711_v54  ;;  %v3727_v35 = vpop.xlane.xlu0 %1628  ;;  %2750 = vrcp.f32 %v3724_v46  ;;  %v1843_v34 = vsel %vm1840_vm4, %v1842_v53, %v1838_v59  ;;  %vm1780_vm9 = vweird.f32 %v2749_v15  ;;  %vm1767_vm11 = vmor %vm1765_vm5, %vm1766_vm6 }
 0x4ac   : > { %v1762_v49 = vsub.f32 1.0, %v1761_v25  ;;  %2752 = vrcp.f32 %v3727_v35  ;;  %v1864_v32 = vmul.f32 %v1843_v34, %v1740_v5  ;;  %vm1849_vm12 = vweird.f32 %v3727_v35  ;;  %vm1781_vm13 = vmor %vm1779_vm7, %vm1780_vm9  ;;  %v1682_v24 = vpop.f32.mrf.mxu1 }
 0x4ad   : > { %v1776_v38 = vsub.f32 1.0, %v1775_v57  ;;  %v1855_v17 = vand.u32 2147483648, %v3727_v35  ;;  %v1797_v30 = vand.u32 2147483647, %v3724_v46  ;;  %v1853_v37 = vand.u32 2147483647, %v3727_v35 }
 0x4ae   : > { %v1763_v9 = vmul.f32 %v2747_v7, %v1762_v49  ;;  %vm1793_vm1 = vweird.f32 %v3724_v46  ;;  %v1878_v31 = vrot.slane %v1864_v32, 4  ;;  %v1799_v43 = vand.u32 2147483648, %v3724_v46 }
 0x4af   : > { %v1777_v19 = vmul.f32 %v2749_v15, %v1776_v38  ;;  %v1856_v3 = vor.u32 1.1754944e-38, %v1855_v17  ;;  %vm3759_vm2 = vcmp.eq.f32.partialorder %v1797_v30, 8.507059e+37  ;;  %vm1854_vm7 = vcmp.eq.f32.partialorder %v1853_v37, 8.507059e+37 }
 0x4b0   : > { %v1764_v39 = vadd.f32 %v2747_v7, %v1763_v9  ;;  %v1800_v25 = vor.u32 1.1754944e-38, %v1799_v43 }
 0x4b1   : > { %v2751_v8 = vpop.eup %2750  ;;  %v1778_v47 = vadd.f32 %v2749_v15, %v1777_v19 }
 0x4b2   : > { %v2753_v2 = vpop.eup %2752  ;;  %v1768_v4 = vsel %vm1767_vm11, %v2747_v7, %v1764_v39  ;;  %v1789_v63 = vmul.f32 %v2751_v8, %v3724_v46  ;;  %vm1794_vm3 = vweird.f32 %v2751_v8 }
 0x4b3   : > { %v1773_v18 = vsel %vm3737_vm8, %v1772_v11, %v1768_v4  ;;  %v1845_v33 = vmul.f32 %v2753_v2, %v3727_v35  ;;  %v1782_v40 = vsel %vm1781_vm13, %v2749_v15, %v1778_v47  ;;  %vm1850_vm4 = vweird.f32 %v2753_v2  ;;  %vm1795_vm5 = vmor %vm1793_vm1, %vm1794_vm3 }
 0x4b4   : > { %v1859_v41 = vmul.f32 %v1773_v18, %v1656_v21  ;;  %v1790_v42 = vsub.f32 1.0, %v1789_v63  ;;  %v1787_v55 = vsel %vm3741_vm10, %v1786_v0, %v1782_v40  ;;  %vm1851_vm6 = vmor %vm1849_vm12, %vm1850_vm4  ;;  %v1685_v39 = vpop.f32.mrf.mxu1  ;;  %vm2115_vm8 = vcmask 392192  }
 0x4b5   : > { %v1846_v54 = vsub.f32 1.0, %v1845_v33  ;;  %v1860_v14 = vmul.f32 %v1787_v55, %v1682_v24 }
 0x4b6   : > { %v1923_v20 = vsel %vm700_vm14, %v1922_v62, %v1859_v41  ;;  %v1924_v23 = vrot.slane %v1859_v41, 4  ;;  %v1791_v16 = vmul.f32 %v2751_v8, %v1790_v42 }
 0x4b7   : > { %v1879_v26 = vsel %vm700_vm14, %v1878_v31, %v1860_v14  ;;  %v1880_v45 = vrot.slane %v1860_v14, 4  ;;  %v1847_v29 = vmul.f32 %v2753_v2, %v1846_v54  ;;  %v1929_v53 = vperm.slane %v1923_v20, %v3275_v44 }
 0x4b8   : > { %v1925_v60 = vsel %vm700_vm14, %v3722_v52, %v1924_v23  ;;  %v1885_v7 = vperm.slane %v1879_v26, %v3275_v44  ;;  %v1792_v15 = vadd.f32 %v2751_v8, %v1791_v16 }
 0x4b9   : > { %v1881_v36 = vsel %vm700_vm14, %v1864_v32, %v1880_v45  ;;  %v1848_v59 = vadd.f32 %v2753_v2, %v1847_v29  ;;  %v1933_v57 = vperm.slane %v1925_v60, %v3275_v44  ;;  %v1948_v0 = vrot.slane %v1929_v53, 4 }
 0x4ba   : > { %v1889_v58 = vperm.slane %v1881_v36, %v3275_v44  ;;  %v1890_v48 = vrot.slane %v1885_v7, 4  ;;  %v1893_v52 = vsel %vm700_vm14, %v1885_v7, %v1892_v61  ;;  %v1796_v49 = vsel %vm1795_vm5, %v2751_v8, %v1792_v15  ;;  %v1743_v61 = vpop.f32.mrf.mxu3 }
 0x4bb   : > { %v1901_v34 = vperm.slane %v1893_v52, %v3295_v1  ;;  %v1852_v50 = vsel %vm1851_vm6, %v2753_v2, %v1848_v59  ;;  %v1801_v46 = vsel %vm3759_vm2, %v1800_v25, %v1796_v49 }
 0x4bc   : > { %v1891_v62 = vsel %vm700_vm14, %v1890_v48, %v3717_v13  ;;  %v1902_v38 = vrot.slane %v1889_v58, 4  ;;  %v1905_v9 = vsel %vm700_vm14, %v1889_v58, %v1904_v6  ;;  %v1857_v5 = vsel %vm1854_vm7, %v1856_v3, %v1852_v50 }
 0x4bd   : > { %v1897_v35 = vperm.slane %v1891_v62, %v3295_v1  ;;  %v1913_v27 = vperm.slane %v1905_v9, %v3295_v1  ;;  %v1916_v32 = vrot.slane %v1901_v34, 4  ;;  %v1865_v19 = vmul.f32 %v1857_v5, %v1743_v61 }
 0x4be   : > { %v1903_v11 = vsel %vm700_vm14, %v1902_v38, %v3720_v51  ;;  %v1861_v56 = vmul.f32 %v1801_v46, %v1685_v39  ;;  %v1960_v13 = vrot.slane %v1933_v57, 4 }
 0x4bf   : > { %v1909_v8 = vperm.slane %v1903_v11, %v3295_v1  ;;  %v1914_v47 = vrot.slane %v1897_v35, 4  ;;  %v1917_v6 = vsel %vm700_vm14, 0.0, %v1916_v32  ;;  %v1920_v17 = vrot.slane %v1913_v27, 4 }
 0x4c0   : > { %v1978_v30 = vsel %vm700_vm14, %v1916_v32, %v1897_v35  ;;  %v1983_v2 = vrot.slane %v1917_v6, 4  ;;  %v1934_v4 = vrot.slane %v1865_v19, 4  ;;  %v1936_v63 = vrot.slane %v1861_v56, 4 }
 0x4c1   : > { %v1921_v37 = vsel %vm700_vm14, 0.0, %v1920_v17  ;;  %v1915_v21 = vsel %vm700_vm14, 0.0, %v1914_v47  ;;  %v1918_v18 = vrot.slane %v1909_v8, 4  ;;  %v1982_v51 = vperm.slane %v1978_v30, %v3275_v44 }
 0x4c2   : > { %v1994_v31 = vrot.slane %v1921_v37, 4  ;;  %v1935_v33 = vsel %vm700_vm14, %v1934_v4, %v1861_v56  ;;  %v1937_v24 = vsel %vm700_vm14, %v1865_v19, %v1936_v63  ;;  %v1984_v40 = vsel %vm700_vm14, %v1983_v2, %v1915_v21 }
 0x4c3   : > { %v1941_v41 = vperm.slane %v1935_v33, %v3275_v44  ;;  %v1945_v42 = vperm.slane %v1937_v24, %v3275_v44  ;;  %v1919_v55 = vsel %vm700_vm14, 0.0, %v1918_v18  ;;  %v1988_v43 = vperm.slane %v1984_v40, %v3275_v44 }
 0x4c4   : > { %v1989_v54 = vsel %vm700_vm14, %v1920_v17, %v1909_v8  ;;  %v1995_v14 = vsel %vm700_vm14, %v1994_v31, %v1919_v55  ;;  %v2002_v3 = vrot.slane %v1982_v51, 4 }
 0x4c5   : > { %v1946_v12 = vrot.slane %v1941_v41, 4  ;;  %v1949_v20 = vsel %vm700_vm14, %v1941_v41, %v1948_v0  ;;  %v1958_v23 = vrot.slane %v1945_v42, 4  ;;  %v1961_v16 = vsel %vm700_vm14, %v1945_v42, %v1960_v13 }
 0x4c6   : > { %v1957_v26 = vperm.slane %v1949_v20, %v3295_v1  ;;  %v1969_v45 = vperm.slane %v1961_v16, %v3295_v1  ;;  %v1993_v29 = vperm.slane %v1989_v54, %v3275_v44  ;;  %v1999_v60 = vperm.slane %v1995_v14, %v3275_v44 }
 0x4c7   : > { %v1947_v7 = vsel %vm700_vm14, %v1946_v12, %v1929_v53  ;;  %v1959_v15 = vsel %vm700_vm14, %v1958_v23, %v1933_v57  ;;  %v2003_v25 = vsel %vm700_vm14, %v1988_v43, %v2002_v3  ;;  %v2000_v36 = vrot.slane %v1988_v43, 4 }
 0x4c8   : > { %v1953_v59 = vperm.slane %v1947_v7, %v3295_v1  ;;  %v1965_v58 = vperm.slane %v1959_v15, %v3295_v1  ;;  %v1972_v48 = vrot.slane %v1957_v26, 4  ;;  %v1976_v52 = vrot.slane %v1969_v45, 4  ;;  %v2125_v15 = vld [vmem:[%s4035_s5 + $0x38] sm:$0xff] }
 0x4c9   : > { %v2011_v49 = vperm.slane %v2003_v25, %v3295_v1  ;;  %v2014_v34 = vrot.slane %v1993_v29, 4  ;;  %v2001_v50 = vsel %vm700_vm14, %v2000_v36, %v1982_v51  ;;  %v2012_v46 = vrot.slane %v1999_v60, 4  ;;  %2144 = vmatpush.msra.mxu0 %v2125_v15  ;;  %v2123_v25 = vld [vmem:[%s4035_s5 + $0x28] sm:$0xff]  ;;  %v2122_v36 = vld [vmem:[%s4035_s5 + $0x20] sm:$0xff] }
 0x4ca   : > { %v1970_v62 = vrot.slane %v1953_v59, 4  ;;  %v1973_v53 = vsel %vm700_vm14, 0.0, %v1972_v48  ;;  %v1977_v57 = vsel %vm700_vm14, 0.0, %v1976_v52  ;;  %v2032_v38 = vsel %vm700_vm14, %v1972_v48, %v1953_v59  ;;  %v2121_v59 = vld [vmem:[%s4035_s5 + $0x18] sm:$0xff]  ;;  %v2119_v48 = vld [vmem:[%s4035_s5 + $0x8] sm:$0xff] }
 0x4cb   : > { %v2037_v9 = vrot.slane %v1973_v53, 4  ;;  %v2048_v61 = vrot.slane %v1977_v57, 4  ;;  %v2015_v5 = vsel %vm700_vm14, %v1999_v60, %v2014_v34  ;;  %v2030_v35 = vrot.slane %v2011_v49, 4 }
 0x4cc   : > { %v2023_v27 = vperm.slane %v2015_v5, %v3295_v1  ;;  %v2007_v32 = vperm.slane %v2001_v50, %v3295_v1  ;;  %v2013_v19 = vsel %vm700_vm14, %v2012_v46, %v1993_v29  ;;  %v1971_v39 = vsel %vm700_vm14, 0.0, %v1970_v62 }
 0x4cd   : > { %v2019_v11 = vperm.slane %v2013_v19, %v3295_v1  ;;  %v1974_v56 = vrot.slane %v1965_v58, 4  ;;  %v2036_v0 = vperm.slane %v2032_v38, %v3275_v44  ;;  %v2038_v13 = vsel %vm700_vm14, %v2037_v9, %v1971_v39 }
 0x4ce   : > { %v2031_v8 = vsel %vm700_vm14, %v2023_v27, %v2030_v35  ;;  %v2028_v47 = vrot.slane %v2023_v27, 4  ;;  %v2026_v6 = vrot.slane %v2007_v32, 4  ;;  %v2042_v17 = vperm.slane %v2038_v13, %v3275_v44  ;;  %v2707_v27 = vld [vmem:[%s4036_s6] ss:$0 sm:$0xff] }
 0x4cf   : > { %2104 = vrot.lane.b32.xlu2 %v2031_v8, %s2974_s2  ;;  %v2024_v30 = vrot.slane %v2019_v11, 4  ;;  %v1975_v2 = vsel %vm700_vm14, 0.0, %v1974_v56  ;;  %v2043_v4 = vsel %vm700_vm14, %v1976_v52, %v1965_v58  ;;  %v2056_v63 = vrot.slane %v2036_v0, 4  ;;  %v2120_v58 = vld [vmem:[%s4035_s5 + $0x10] sm:$0xff]  ;;  %v2118_v52 = vld [vmem:[%s4035_s5] sm:$0xff] }
 0x4d0   : > { %v2029_v37 = vsel %vm700_vm14, %v2028_v47, %v2011_v49  ;;  %v2027_v21 = vsel %vm700_vm14, %v2019_v11, %v2026_v6  ;;  %v2047_v18 = vperm.slane %v2043_v4, %v3275_v44  ;;  %v2049_v51 = vsel %vm700_vm14, %v2048_v61, %v1975_v2 }
 0x4d1   : > { %2096 = vrot.lane.b32.xlu0 %v2029_v37, %s2975_s9  ;;  %2088 = vrot.lane.b32.xlu1 %v2027_v21, %s2976_s14  ;;  %v2053_v31 = vperm.slane %v2049_v51, %v3275_v44  ;;  %v2057_v33 = vsel %vm700_vm14, %v2042_v17, %v2056_v63  ;;  %v2054_v24 = vrot.slane %v2042_v17, 4  ;;  %v2025_v40 = vsel %vm700_vm14, %v2024_v30, %v2007_v32  ;;  %v2256_v21 = vld [vmem:[#allocation8 + $0x38] sm:$0xff]  ;;  %v2254_v51 = vld [vmem:[#allocation8 + $0x28] sm:$0xff] }
 0x4d2   : > { %v2065_v41 = vperm.slane %v2057_v33, %v3295_v1  ;;  %v2068_v42 = vrot.slane %v2047_v18, 4  ;;  %2275 = vmatpush.msra.mxu1 %v2256_v21  ;;  %v2392_v21 = vld [vmem:[%s4041_s11 + $0x70] sm:$0xff] }
 0x4d3   : > { %v2055_v55 = vsel %vm700_vm14, %v2054_v24, %v2036_v0  ;;  %v2066_v43 = vrot.slane %v2053_v31, 4  ;;  %v2252_v24 = vld [vmem:[#allocation8 + $0x18] sm:$0xff] }
 0x4d4   : > { %v2069_v54 = vsel %vm700_vm14, %v2053_v31, %v2068_v42  ;;  %v2084_v14 = vrot.slane %v2065_v41, 4  ;;  %v2061_v3 = vperm.slane %v2055_v55, %v3295_v1  ;;  %v2253_v31 = vld [vmem:[#allocation8 + $0x20] sm:$0xff]  ;;  %v2250_v55 = vld [vmem:[#allocation8 + $0x8] sm:$0xff] }
 0x4d5   : > { %v2077_v12 = vperm.slane %v2069_v54, %v3295_v1  ;;  %v2067_v44 = vsel %vm700_vm14, %v2066_v43, %v2047_v18  ;;  %v2255_v18 = vld [vmem:[#allocation8 + $0x30] sm:$0xff]  ;;  %v2249_v43 = vld [vmem:[#allocation8] sm:$0xff] }
 0x4d6   : > { %v2073_v20 = vperm.slane %v2067_v44, %v3295_v1  ;;  %v2080_v23 = vrot.slane %v2061_v3, 4  ;;  %v2124_v1 = vld [vmem:[%s4035_s5 + $0x30] sm:$0xff]  ;;  %2276 = vmatpush.msra.mxu1 %v2255_v18  ;;  %v2710_v18 = vld [vmem:[%s4040_s10] ss:$0 sm:$0xff] }
 0x4d7   : > { %v2085_v16 = vsel %vm700_vm14, %v2077_v12, %v2084_v14  ;;  %v2082_v26 = vrot.slane %v2077_v12, 4  ;;  %2145 = vmatpush.msra.mxu0 %v2124_v1 }
 0x4d8   : > { %2106 = vrot.lane.b32.xlu2 %v2085_v16, %s2974_s2  ;;  %v2078_v45 = vrot.slane %v2073_v20, 4  ;;  %v2081_v29 = vsel %vm700_vm14, %v2073_v20, %v2080_v23  ;;  %2277 = vmatpush.msra.mxu1 %v2254_v51  ;;  %v2390_v51 = vld [vmem:[%s4041_s11 + $0x60] sm:$0xff]  ;;  %s2437_s2 = scalar_lea.hbm %s4043_s13, %s2598_s16 }
 0x4d9   : > { %v2083_v60 = vsel %vm700_vm14, %v2082_v26, %v2065_v41  ;;  %2090 = vrot.lane.b32.xlu0 %v2081_v29, %s2976_s14  ;;  %2146 = vmatpush.msra.mxu0 %v2123_v25  ;;  %v2251_v41 = vld [vmem:[#allocation8 + $0x10] sm:$0xff]  ;;  %s2440_s14 = sshll.u32 %s2437_s2, 4  ;;  %s2441_s14 = int_to_ptr.hbm [resolvable:$true] %s2440_s14 }
 0x4da   : > { %2098 = vrot.lane.b32.xlu1 %v2083_v60, %s2975_s9  ;;  %v2079_v7 = vsel %vm700_vm14, %v2078_v45, %v2061_v3  ;;  %vm2112_vm14 = vcmask 261120   ;;  %2278 = vmatpush.msra.mxu1 %v2253_v31  ;;  %s2438_s9 = sshll.u32 %s506_s30, 4  ;;  %s2900_s19 = sshra.s32 %s2441_s14, 4  ;;  %s2439_s9 = int_to_ptr.vmem [resolvable:$true] %s2438_s9  ;;  %s2901_s19 = int_to_ptr.hbm [resolvable:$true] %s2900_s19 }
 0x4db   : > { %2147 = vmatpush.msra.mxu0 %v2122_v36  ;;  %s2902_s27 = scalar_lea.hbm %s2901_s19, 16  ;;  %p2907_p9 = scmp.lt.s32.totalorder %s2901_s19, %s4043_s13 }
 0x4dc   : > { %2279 = vmatpush.msra.mxu1 %v2252_v24  ;;  %p2903_p1 = scmp.ne.s32.totalorder %s2901_s19, %s2902_s27  ;;  %p2908_p10 = scmp.lt.s32.totalorder %s2906_s21, %s2902_s27 }
 0x4dd   : > { %2148 = vmatpush.msra.mxu0 %v2121_v59 }
 0x4de   : > { %2280 = vmatpush.msra.mxu1 %v2251_v41  ;;  %p2904_p4 = pnand %p2903_p1, %p3134_p3  ;;  %p2909_p2 = por %p2908_p10, %p2907_p9 }
 0x4df   : > { %2149 = vmatpush.msra.mxu0 %v2120_v58 }
 0x4e0   : > { %2281 = vmatpush.msra.mxu1 %v2250_v55  ;;  %p2905_p8 = pneg %p2904_p4 }
 0x4e1   : > { %2150 = vmatpush.msra.mxu0 %v2119_v48 }
 0x4e2   : > { %2282 = vmatpush.msra.mxu1 %v2249_v43  ;;  %v2386_v43 = vld [vmem:[%s4041_s11 + $0x40] sm:$0xff]  ;;  %p2910_p11 = pnand %p2909_p2, %p2905_p8 }
 0x4e3   : > { %2151 = vmatpush.msra.mxu0 %v2118_v52 }
 0x529   : > { %v2105_v46 = vpop.permute.xlu2 %2104 }
 0x532   : > { %v2107_v61 = vpop.permute.xlu2 %2106 }
 0x543   : > { %v2097_v49 = vpop.permute.xlu0 %2096  ;;  %v2089_v34 = vpop.permute.xlu1 %2088 }
 0x544   : > { %v2110_v50 = vsel %vm1404_vm15, %v2025_v40, %v2089_v34 }
 0x545   : > { %v2113_v62 = vsel %vm2112_vm14, %v2110_v50, %v2097_v49 }
 0x546   : > { %v2116_v53 = vsel %vm2115_vm8, %v2113_v62, %v2105_v46 }
 0x547   : > { %2586 = vmatmul.msk.f32.vlgmr.msra.gmra.mxu0 %vm511_vm0, %v2116_v53 }
 0x54b   : > { %v2091_v57 = vpop.permute.xlu0 %2090 }
 0x54c   : > { %v2099_v38 = vpop.permute.xlu1 %2098  ;;  %v2111_v9 = vsel %vm1404_vm15, %v2079_v7, %v2091_v57 }
 0x54d   : > { %v2114_v5 = vsel %vm2112_vm14, %v2111_v9, %v2099_v38 }
 0x54e   : > { %v2117_v35 = vsel %vm2115_vm8, %v2114_v5, %v2107_v61 }
 0x54f   : > { %2587 = vmatmul.msk.f32.gmra.mxu0 %vm511_vm0, %v2117_v35  ;;  %v2708_v35 = vld [vmem:[%s4037_s7] ss:$0 sm:$0xff] }
 0x5c4   : > { %v2153_v32 = vpop.f32.mrf.mxu0 }
 0x5c5   : > { %v2154_v19 = vadd.f32 %v2707_v27, %v2153_v32 }
 0x5c7   : > { %v2159_v39 = vadd.f32 %v2154_v19, %v3249_v22 }
 0x5c9   : > { %v2163_v11 = vsel %vm511_vm0, %v2159_v39, 0.0 }
 0x5ca   : > { %2164 = vadd.xlane.f32.xlu0 %v2163_v11 }
 0x5cc   : > { %v2156_v56 = vpop.f32.mrf.mxu0 }
 0x5cd   : > { %v2157_v0 = vadd.f32 %v2707_v27, %v2156_v56 }
 0x5cf   : > { %v2160_v13 = vadd.f32 %v2157_v0, %v3256_v28 }
 0x5d1   : > { %v2166_v8 = vsel %vm511_vm0, %v2160_v13, 0.0 }
 0x5d2   : > { %2167 = vadd.xlane.f32.xlu1 %v2166_v8 }
 0x63d   : > { %v2165_v47 = vpop.xlane.xlu0 %2164 }
 0x63e   : > { %v2169_v6 = vmul.f32 %v2165_v47, %v3184_v10 }
 0x640   : > { %v3890_v17 = vsub.f32 %v2159_v39, %v2169_v6  ;;  %v2709_v39 = vld [vmem:[%s4038_s8] ss:$0 sm:$0xff] }
 0x642   : > { %v2173_v30 = vmul.f32 %v3890_v17, %v3890_v17 }
 0x644   : > { %v2175_v22 = vsel %vm511_vm0, %v2173_v30, 0.0 }
 0x645   : > { %2176 = vadd.xlane.f32.xlu2 %v2175_v22  ;;  %v2168_v2 = vpop.xlane.xlu1 %2167 }
 0x646   : > { %v2170_v4 = vmul.f32 %v2168_v2, %v3184_v10 }
 0x648   : > { %v3896_v63 = vsub.f32 %v2160_v13, %v2170_v4 }
 0x64a   : > { %v2174_v28 = vmul.f32 %v3896_v63, %v3896_v63 }
 0x64c   : > { %v2178_v37 = vsel %vm511_vm0, %v2174_v28, 0.0 }
 0x64d   : > { %2179 = vadd.xlane.f32.xlu0 %v2178_v37  ;;  %v2393_v37 = vld [vmem:[%s4041_s11 + $0x78] sm:$0xff] }
 0x64e   : > { %2398 = vmatpush.msra.mxu2 %v2393_v37 }
 0x650   : > { %2399 = vmatpush.msra.mxu2 %v2392_v21 }
 0x6b8   : > { %v2177_v33 = vpop.xlane.xlu2 %2176 }
 0x6b9   : > { %v2181_v40 = vmul.f32 %v2177_v33, %v3184_v10  ;;  %v2389_v33 = vld [vmem:[%s4041_s11 + $0x58] sm:$0xff] }
 0x6bb   : > { %v2183_v42 = vadd.f32 1e-06, %v2181_v40  ;;  %v2388_v40 = vld [vmem:[%s4041_s11 + $0x50] sm:$0xff] }
 0x6bd   : > { %2754 = vrsqrt.f32 %v2183_v42  ;;  %vm2192_vm15 = vcmp.eq.f32.partialorder %v2183_v42, inf  ;;  %v2195_v15 = vand.u32 2147483648, %v2183_v42  ;;  %vm2194_vm9 = vcmp.eq.f32.partialorder %v2183_v42, 0.0 }
 0x6c0   : > { %v2180_v54 = vpop.xlane.xlu0 %2179 }
 0x6c1   : > { %v2182_v14 = vmul.f32 %v2180_v54, %v3184_v10 }
 0x6c3   : > { %v2755_v3 = vpop.eup %2754  ;;  %v2184_v12 = vadd.f32 1e-06, %v2182_v14 }
 0x6c4   : > { %v2186_v44 = vmul.f32 %v2755_v3, %v2183_v42 }
 0x6c5   : > { %2756 = vrsqrt.f32 %v2184_v12  ;;  %vm2204_vm10 = vcmp.eq.f32.partialorder %v2184_v12, inf  ;;  %v2207_v48 = vand.u32 2147483648, %v2184_v12  ;;  %vm2206_vm11 = vcmp.eq.f32.partialorder %v2184_v12, 0.0 }
 0x6c6   : > { %v2187_v20 = vmul.f32 %v2755_v3, %v2186_v44 }
 0x6c8   : > { %v2188_v23 = vmul.f32 0.5, %v2187_v20 }
 0x6ca   : > { %v2189_v16 = vsub.f32 1.5, %v2188_v23  ;;  %v2384_v23 = vld [vmem:[%s4041_s11 + $0x30] sm:$0xff] }
 0x6cb   : > { %v2757_v26 = vpop.eup %2756 }
 0x6cc   : > { %v2190_v45 = vmul.f32 %v2755_v3, %v2189_v16  ;;  %v2198_v29 = vmul.f32 %v2757_v26, %v2184_v12  ;;  %v2385_v3 = vld [vmem:[%s4041_s11 + $0x38] sm:$0xff] }
 0x6ce   : > { %v2191_v60 = vmul.f32 %v2190_v45, %v2183_v42  ;;  %v2199_v7 = vmul.f32 %v2757_v26, %v2198_v29  ;;  %v2383_v29 = vld [vmem:[%s4041_s11 + $0x28] sm:$0xff] }
 0x6d0   : > { %v2193_v1 = vsel %vm2192_vm15, %v2183_v42, %v2191_v60  ;;  %v2200_v25 = vmul.f32 0.5, %v2199_v7  ;;  %v2387_v42 = vld [vmem:[%s4041_s11 + $0x48] sm:$0xff] }
 0x6d1   : > { %v2196_v36 = vsel %vm2194_vm9, %v2195_v15, %v2193_v1  ;;  %v2382_v1 = vld [vmem:[%s4041_s11 + $0x20] sm:$0xff] }
 0x6d2   : > { %v2201_v10 = vsub.f32 1.5, %v2200_v25  ;;  %2758 = vrcp.f32 %v2196_v36  ;;  %v2220_v62 = vand.u32 2147483648, %v2196_v36  ;;  %v2218_v57 = vand.u32 2147483647, %v2196_v36 }
 0x6d3   : > { %vm2214_vm13 = vweird.f32 %v2196_v36 }
 0x6d4   : > { %v2202_v59 = vmul.f32 %v2757_v26, %v2201_v10  ;;  %v2221_v61 = vor.u32 1.1754944e-38, %v2220_v62  ;;  %vm2219_vm2 = vcmp.eq.f32.partialorder %v2218_v57, 8.507059e+37  ;;  %v2379_v62 = vld [vmem:[%s4041_s11 + $0x8] sm:$0xff] }
 0x6d6   : > { %v2203_v58 = vmul.f32 %v2202_v59, %v2184_v12  ;;  %v2381_v59 = vld [vmem:[%s4041_s11 + $0x18] sm:$0xff] }
 0x6d8   : > { %v2759_v52 = vpop.eup %2758  ;;  %v2205_v49 = vsel %vm2204_vm10, %v2184_v12, %v2203_v58 }
 0x6d9   : > { %v2210_v34 = vmul.f32 %v2759_v52, %v2196_v36  ;;  %v2208_v50 = vsel %vm2206_vm11, %v2207_v48, %v2205_v49  ;;  %vm2215_vm12 = vweird.f32 %v2759_v52 }
 0x6da   : > { %2760 = vrcp.f32 %v2208_v50  ;;  %vm2216_vm1 = vmor %vm2214_vm13, %vm2215_vm12  ;;  %v2235_v56 = vand.u32 2147483648, %v2208_v50  ;;  %v2233_v8 = vand.u32 2147483647, %v2208_v50  ;;  %vm2229_vm4 = vweird.f32 %v2208_v50 }
 0x6db   : > { %v2211_v46 = vsub.f32 1.0, %v2210_v34 }
 0x6dc   : > { %v2236_v30 = vor.u32 1.1754944e-38, %v2235_v56  ;;  %vm2234_vm6 = vcmp.eq.f32.partialorder %v2233_v8, 8.507059e+37 }
 0x6dd   : > { %v2212_v53 = vmul.f32 %v2759_v52, %v2211_v46 }
 0x6df   : > { %v2213_v38 = vadd.f32 %v2759_v52, %v2212_v53  ;;  %v2378_v53 = vld [vmem:[%s4041_s11] sm:$0xff] }
 0x6e0   : > { %v2761_v9 = vpop.eup %2760 }
 0x6e1   : > { %v2217_v5 = vsel %vm2216_vm1, %v2759_v52, %v2213_v38  ;;  %v2225_v27 = vmul.f32 %v2761_v9, %v2208_v50  ;;  %vm2230_vm3 = vweird.f32 %v2761_v9  ;;  %v2380_v52 = vld [vmem:[%s4041_s11 + $0x10] sm:$0xff] }
 0x6e2   : > { %v2222_v32 = vsel %vm2219_vm2, %v2221_v61, %v2217_v5  ;;  %vm2231_vm5 = vmor %vm2229_vm4, %vm2230_vm3 }
 0x6e3   : > { %v2223_v19 = vmul.f32 %v2222_v32, %v3890_v17  ;;  %v2226_v11 = vsub.f32 1.0, %v2225_v27 }
 0x6e5   : > { %v2242_v0 = vmul.f32 %v2708_v35, %v2223_v19  ;;  %v2227_v13 = vmul.f32 %v2761_v9, %v2226_v11 }
 0x6e7   : > { %v3910_v47 = vadd.f32 %v2709_v39, %v2242_v0  ;;  %v2228_v6 = vadd.f32 %v2761_v9, %v2227_v13 }
 0x6e9   : > { %2588 = vmatmul.msk.f32.vlgmr.msra.gmra.mxu1 %vm511_vm0, %v3910_v47  ;;  %v2232_v17 = vsel %vm2231_vm5, %v2761_v9, %v2228_v6 }
 0x6ea   : > { %v2237_v22 = vsel %vm2234_vm6, %v2236_v30, %v2232_v17 }
 0x6eb   : > { %v2238_v2 = vmul.f32 %v2237_v22, %v3896_v63  ;;  %v2391_v63 = vld [vmem:[%s4041_s11 + $0x68] sm:$0xff] }
 0x6ec   : > { %2400 = vmatpush.msra.mxu2 %v2391_v63 }
 0x6ed   : > { %v2243_v4 = vmul.f32 %v2708_v35, %v2238_v2 }
 0x6ee   : > { %2401 = vmatpush.msra.mxu2 %v2390_v51 }
 0x6ef   : > { %v3915_v28 = vadd.f32 %v2709_v39, %v2243_v4 }
 0x6f0   : > { %2402 = vmatpush.msra.mxu2 %v2389_v33 }
 0x6f1   : > { %2589 = vmatmul.msk.f32.gmra.mxu1 %vm511_vm0, %v3915_v28 }
 0x6f2   : > { %2403 = vmatpush.msra.mxu2 %v2388_v40 }
 0x6f4   : > { %2404 = vmatpush.msra.mxu2 %v2387_v42 }
 0x6f6   : > { %2405 = vmatpush.msra.mxu2 %v2386_v43 }
 0x6f8   : > { %2406 = vmatpush.msra.mxu2 %v2385_v3 }
 0x6fa   : > { %2407 = vmatpush.msra.mxu2 %v2384_v23 }
 0x6fc   : > { %2408 = vmatpush.msra.mxu2 %v2383_v29 }
 0x6fe   : > { %2409 = vmatpush.msra.mxu2 %v2382_v1 }
 0x700   : > { %2410 = vmatpush.msra.mxu2 %v2381_v59 }
 0x702   : > { %2411 = vmatpush.msra.mxu2 %v2380_v52 }
 0x704   : > { %2412 = vmatpush.msra.mxu2 %v2379_v62  ;;  %v2711_v62 = vld [vmem:[%s4042_s12] ss:$0 sm:$0xff] }
 0x706   : > { %2413 = vmatpush.msra.mxu2 %v2378_v53 }
 0x766   : > { %v2284_v31 = vpop.f32.mrf.mxu1 }
 0x767   : > { %v3937_v24 = vadd.f32 %v2710_v18, %v2284_v31 }
 0x769   : > { %v3943_v41 = vmul.f32 0.70710677, %v3937_v24 }
 0x76b   : > { %v2294_v55 = vmul.f32 %v3943_v41, %v3943_v41 }
 0x76d   : > { %v2295_v54 = vmin.f32 %v2294_v55, 16.0 }
 0x76e   : > { %v2287_v14 = vpop.f32.mrf.mxu1 }
 0x76f   : > { %v2296_v12 = vmul.f32 2.1237322e-06, %v2295_v54  ;;  %v2307_v44 = vmul.f32 3.8918573e-05, %v2295_v54  ;;  %v3956_v20 = vadd.f32 %v2710_v18, %v2287_v14 }
 0x771   : > { %v2297_v16 = vadd.f32 0.00028619796, %v2296_v12  ;;  %v2308_v26 = vadd.f32 0.001143296, %v2307_v44  ;;  %v3962_v45 = vmul.f32 0.70710677, %v3956_v20 }
 0x773   : > { %v2298_v60 = vmul.f32 %v2297_v16, %v2295_v54  ;;  %v2309_v7 = vmul.f32 %v2308_v26, %v2295_v54  ;;  %v2334_v15 = vmul.f32 %v3962_v45, %v3962_v45 }
 0x775   : > { %v2310_v25 = vadd.f32 0.014752088, %v2309_v7  ;;  %v2299_v36 = vadd.f32 0.0036580483, %v2298_v60  ;;  %v2335_v10 = vmin.f32 %v2334_v15, 16.0 }
 0x777   : > { %v2311_v58 = vmul.f32 %v2310_v25, %v2295_v54  ;;  %v2336_v48 = vmul.f32 2.1237322e-06, %v2335_v10  ;;  %v2347_v49 = vmul.f32 3.8918573e-05, %v2335_v10  ;;  %v2300_v50 = vmul.f32 %v2299_v36, %v2295_v54 }
 0x778   : > { %v2290_v25 = vmul.f32 0.5, %v3937_v24 }
 0x779   : > { %v2312_v34 = vadd.f32 0.112945676, %v2311_v58  ;;  %v2337_v46 = vadd.f32 0.00028619796, %v2336_v48  ;;  %v2348_v57 = vadd.f32 0.001143296, %v2347_v49 }
 0x77a   : > { %v2301_v35 = vadd.f32 0.05243302, %v2300_v50  ;;  %v2291_v50 = vmul.f32 0.5, %v3956_v20 }
 0x77b   : > { %v2313_v38 = vmul.f32 %v2312_v34, %v2295_v54  ;;  %v2338_v9 = vmul.f32 %v2337_v46, %v2335_v10  ;;  %v2349_v61 = vmul.f32 %v2348_v57, %v2335_v10 }
 0x77c   : > { %v2302_v56 = vmul.f32 %v2301_v35, %v2295_v54 }
 0x77d   : > { %v2314_v5 = vadd.f32 0.4994258, %v2313_v38  ;;  %v2350_v27 = vadd.f32 0.014752088, %v2349_v61  ;;  %v2339_v19 = vadd.f32 0.0036580483, %v2338_v9 }
 0x77e   : > { %v2303_v6 = vadd.f32 0.18741608, %v2302_v56 }
 0x77f   : > { %v2315_v32 = vmul.f32 %v2314_v5, %v2295_v54  ;;  %v2351_v39 = vmul.f32 %v2350_v27, %v2335_v10  ;;  %v2340_v13 = vmul.f32 %v2339_v19, %v2335_v10 }
 0x780   : > { %v2304_v4 = vmul.f32 %v2303_v6, %v2295_v54 }
 0x781   : > { %v2316_v11 = vadd.f32 1.0, %v2315_v32  ;;  %v2352_v0 = vadd.f32 0.112945676, %v2351_v39  ;;  %v2341_v17 = vadd.f32 0.05243302, %v2340_v13 }
 0x782   : > { %v2305_v31 = vadd.f32 1.1283791, %v2304_v4 }
 0x783   : > { %2762 = vrcp.f32 %v2316_v11  ;;  %v2353_v8 = vmul.f32 %v2352_v0, %v2335_v10  ;;  %v2342_v63 = vmul.f32 %v2341_v17, %v2335_v10  ;;  %v2328_v51 = vand.u32 2147483648, %v2316_v11 }
 0x784   : > { %v2326_v40 = vand.u32 2147483647, %v2316_v11  ;;  %vm2322_vm14 = vweird.f32 %v2316_v11  ;;  %v2306_v3 = vmul.f32 %v2305_v31, %v3943_v41 }
 0x785   : > { %v2354_v30 = vadd.f32 0.4994258, %v2353_v8  ;;  %v2343_v42 = vadd.f32 0.18741608, %v2342_v63  ;;  %v2329_v43 = vor.u32 1.1754944e-38, %v2328_v51 }
 0x786   : > { %vm2327_vm15 = vcmp.eq.f32.partialorder %v2326_v40, 8.507059e+37 }
 0x787   : > { %v2355_v22 = vmul.f32 %v2354_v30, %v2335_v10  ;;  %v2344_v44 = vmul.f32 %v2343_v42, %v2335_v10 }
 0x789   : > { %v2763_v2 = vpop.eup %2762  ;;  %v2356_v21 = vadd.f32 1.0, %v2355_v22  ;;  %v2345_v7 = vadd.f32 1.1283791, %v2344_v44 }
 0x78a   : > { %v2318_v37 = vmul.f32 %v2763_v2, %v2316_v11  ;;  %vm2323_vm7 = vweird.f32 %v2763_v2 }
 0x78b   : > { %2764 = vrcp.f32 %v2356_v21  ;;  %vm2324_vm8 = vmor %vm2322_vm14, %vm2323_vm7  ;;  %v2368_v60 = vand.u32 2147483648, %v2356_v21  ;;  %v2366_v1 = vand.u32 2147483647, %v2356_v21  ;;  %vm2362_vm10 = vweird.f32 %v2356_v21 }
 0x78c   : > { %v2319_v18 = vsub.f32 1.0, %v2318_v37  ;;  %v2346_v10 = vmul.f32 %v2345_v7, %v3962_v45 }
 0x78d   : > { %v2369_v41 = vor.u32 1.1754944e-38, %v2368_v60  ;;  %vm2367_vm12 = vcmp.eq.f32.partialorder %v2366_v1, 8.507059e+37 }
 0x78e   : > { %v2320_v33 = vmul.f32 %v2763_v2, %v2319_v18 }
 0x790   : > { %v2321_v55 = vadd.f32 %v2763_v2, %v2320_v33 }
 0x791   : > { %v2765_v14 = vpop.eup %2764 }
 0x792   : > { %v2325_v12 = vsel %vm2324_vm8, %v2763_v2, %v2321_v55  ;;  %v2358_v23 = vmul.f32 %v2765_v14, %v2356_v21  ;;  %vm2363_vm9 = vweird.f32 %v2765_v14 }
 0x793   : > { %v2330_v54 = vsel %vm2327_vm15, %v2329_v43, %v2325_v12  ;;  %vm2364_vm11 = vmor %vm2362_vm10, %vm2363_vm9 }
 0x794   : > { %v2331_v16 = vmul.f32 %v2330_v54, %v2306_v3  ;;  %v2359_v26 = vsub.f32 1.0, %v2358_v23 }
 0x796   : > { %v2590_v29 = vclamps-f32 %v2331_v16, 1.0  ;;  %v2360_v15 = vmul.f32 %v2765_v14, %v2359_v26 }
 0x798   : > { %v2374_v36 = vadd.f32 1.0, %v2590_v29  ;;  %v2361_v59 = vadd.f32 %v2765_v14, %v2360_v15 }
 0x79a   : > { %v2376_v58 = vmul.f32 %v2374_v36, %v2290_v25  ;;  %v2365_v48 = vsel %vm2364_vm11, %v2765_v14, %v2361_v59 }
 0x79b   : > { %v2370_v52 = vsel %vm2367_vm12, %v2369_v41, %v2365_v48 }
 0x79c   : > { %2414 = vmatmul.f32.vlgmr.msra.gmra.mxu2 %v2376_v58  ;;  %v2371_v49 = vmul.f32 %v2370_v52, %v2346_v10 }
 0x79e   : > { %v2591_v34 = vclamps-f32 %v2371_v49, 1.0 }
 0x7a0   : > { %v2375_v46 = vadd.f32 1.0, %v2591_v34 }
 0x7a2   : > { %v2377_v24 = vmul.f32 %v2375_v46, %v2291_v50 }
 0x7a4   : > { %2417 = vmatmul.f32.gmra.mxu2 %v2377_v24 }
 0x81f   : > { %v2415_v53 = vpop.f32.mrf.mxu2 }
 0x820   : > { %v2416_v57 = vadd.f32 %v2711_v62, %v2415_v53 }
 0x822   : > { %v2421_v45 = vadd.f32 %v2416_v57, %v3910_v47 }
 0x824   : > { %2423 = vst.msk [vmem:[%s506_s30] sm:$0xff] %vm511_vm0, %v2421_v45 }
 0x827   : > { %v2418_v20 = vpop.f32.mrf.mxu2 }
 0x828   : > { %v2419_v38 = vadd.f32 %v2711_v62, %v2418_v20 }
 0x82a   : > { %v2422_v9 = vadd.f32 %v2419_v38, %v3915_v28 }
 0x82c   : > { %2424 = vst.msk [vmem:[%s506_s30 + $0x8] sm:$0xff] %vm511_vm0, %v2422_v9 }
 0x82d   : > { %2913 = shalt.err (!%p2910_p11)
}
 0x82e   : > { %s2977_s17 = smov 128   ;;  %s2978_s16 = smov 8  }
 0x82f   : > { %2613 = dma.vmem_to_hbm [thread:$0]  (%p3134_p3), %s2439_s9, 256, %s2441_s14, %s2426_s29, %s2977_s17, %s2977_s17, %s2978_s16  }
 0x830 PF: > { %s2455_s18 = sand.u32 1, %s2948_s25   ;;  %p4075_p12 = scmp.ge.s32.totalorder %s2960_s28, 2 }
 0x831   : > { %s2456_s15 = scalar_lea.sflag [#allocation4], %s2455_s18 }
 0x832   : > { %p2630_p13 = pnand %p4075_p12, %p3084_p6 }
 0x834   : > { %p2631_p0 = pneg %p2630_p13 }
 0x836   : > { %2943 = dma.done.wait (%p2631_p0), %s2456_s15, 256  }
 0x837   : > { %2945 = vsyncadd (%p2631_p0), %s2456_s15, 4294967040  ;;  %s4076_s28 = sld [smem:[#allocation17_spill]]  ;;  %s4079_s25 = smov %s2952_s26 }
 0x838   : > { %s4077_s2 = sld [smem:[#allocation15_spill]] }
 0x839   : > { %s4078_s27 = sld [smem:[#allocation18_spill]] }
 0x83d   : > { %p28_p5 = scmp.ge.s32.totalorder %s4076_s28, 4  }
 0x83e   : > { %s4080_s26 = smov %s4077_s2 }
 0x83f   :  { %30 = sbr.rel (!%p28_p5) target bundleno = 11 (0xb), region = 129 }
 0x844   :  { %2462 = vsyncpa [#allocation3], 1 }
 0x845   :  { %2464 = vsyncpa [#allocation3 + $0x1], 1 }
 0x846   :  { %2465 = vsyncpa [#allocation6], 1 }
 0x847   :  { %2466 = vsyncpa [#allocation9], 1 }
 0x848   :  { %2467 = vsyncpa [#allocation4], 1 }
 0x849   :  { %2469 = vsyncpa [#allocation4 + $0x1], 1 }

</bundles_post_ra>
